<compile_context>
chip_gen: v7x
topology: tpu7x:2x2x1
jax: 0.10.0
libtpu: 0.0.40
codegen_flags: <defaults>
</compile_context>

<pallas_src>
import functools

import jax
import jax.numpy as jnp
from jax.experimental import pallas as pl
from jax.experimental.pallas import tpu as pltpu

HIGH = jax.lax.Precision.HIGHEST  # pin f32 matmul fidelity explicitly


def rnn_mlp_kernel(x_ref, w_ref, o_ref, *, in_dim, hidden1, hidden2, out_dim):
    """One batch-block, fully VMEM-resident.

    x_ref : (Bb, T, I)  raw batch_first input block
    w_ref : (Rp, 128)   packed parameter slab (weights pre-transposed to (in, out))
    o_ref : (Bb, O)
    """
    I, H1, H2, O = in_dim, hidden1, hidden2, out_dim
    brow = max(I, H1, H2)  # row holding the packed bias vectors

    # ---- Static sub-views of the single packed parameter slab (one DMA). ----
    wih = w_ref[0:I, 0:H1]                             # (I,  H1)
    whh = w_ref[0:H1, H1:2 * H1]                       # (H1, H1)
    w1 = w_ref[0:H1, 2 * H1:2 * H1 + H2]               # (H1, H2)
    w2 = w_ref[0:H2, 2 * H1 + H2:2 * H1 + H2 + O]      # (H2, O)
    brnn = w_ref[brow:brow + 1, 0:H1]                  # (1, H1) = b_ih + b_hh
    b1 = w_ref[brow:brow + 1, H1:H1 + H2]              # (1, H2)
    b2 = w_ref[brow:brow + 1, H1 + H2:H1 + H2 + O]     # (1, O)

    xv = x_ref[...]                                    # (Bb, T, I)
    T = xv.shape[1]

    # ---- Input projection per timestep: independent of h, so it sits off the
    #      serial critical path; bias folded in once per step. ----
    xp = [jnp.dot(xv[:, t, :], wih, precision=HIGH,
                  preferred_element_type=jnp.float32) + brnn
          for t in range(T)]                           # T x (Bb, H1)

    # ---- Recurrence h_t = tanh(x_t W_ih + h_{t-1} W_hh + b): unrolled, t=0 peeled.
    h = jnp.tanh(xp[0])
    for t in range(1, T):
        h = jnp.tanh(xp[t] + jnp.dot(h, whh, precision=HIGH,
                                     preferred_element_type=jnp.float32))

    # ---- Head: Linear -> LeakyReLU(0.05) -> Dropout(eval) -> Linear -> Sigmoid.
    z1 = jnp.dot(h, w1, precision=HIGH, preferred_element_type=jnp.float32) + b1
    a1 = jnp.where(z1 >= 0, z1, 0.05 * z1)             # LeakyReLU(negative_slope=0.05)
    # TODO(synk): Dropout(0.2) is stochastic in train mode; eval-mode identity here.
    z2 = jnp.dot(a1, w2, precision=HIGH, preferred_element_type=jnp.float32) + b2
    o_ref[...] = jax.nn.sigmoid(z2)


def pack_params(wih, whh, brnn, w1, b1, w2, b2):
    """One-time packing of all weights/biases into a lane-dense f32 slab.

    Layout (cols): [wih | whh | w1 | w2] in the weight rows, and
    [brnn | b1 | b2] in row `max(I,H1,H2)`; padded to (mult-of-8, mult-of-128).
    """
    I, H1 = wih.shape
    H2 = w1.shape[1]
    O = w2.shape[1]
    brow = max(I, H1, H2)
    lanes = max(2 * H1 + H2 + O, H1 + H2 + O)
    rows_p = ((brow + 1 + 7) // 8) * 8
    lanes_p = ((lanes + 127) // 128) * 128
    slab = jnp.zeros((rows_p, lanes_p), jnp.float32)
    slab = slab.at[0:I, 0:H1].set(wih)
    slab = slab.at[0:H1, H1:2 * H1].set(whh)
    slab = slab.at[0:H1, 2 * H1:2 * H1 + H2].set(w1)
    slab = slab.at[0:H2, 2 * H1 + H2:2 * H1 + H2 + O].set(w2)
    slab = slab.at[brow, 0:H1].set(brnn.reshape(-1))
    slab = slab.at[brow, H1:H1 + H2].set(b1.reshape(-1))
    slab = slab.at[brow, H1 + H2:H1 + H2 + O].set(b2.reshape(-1))
    return slab


@functools.partial(jax.jit, static_argnames=("in_dim", "hidden1", "hidden2",
                                             "out_dim", "block_b"))
def rnn_forward(x, slab, *, in_dim, hidden1, hidden2, out_dim, block_b=None):
    """x: (B, T, I) float32 batch_first -> (B, O) float32."""
    B, T, I = x.shape
    assert I == in_dim
    if block_b is None:
        block_b = B                          # demo size fits one block
    assert B % block_b == 0 and (block_b % 8 == 0 or block_b == B)
    nb = B // block_b
    O = out_dim

    kern = functools.partial(rnn_mlp_kernel, in_dim=in_dim, hidden1=hidden1,
                             hidden2=hidden2, out_dim=out_dim)

    flops = 2 * B * (T * I * hidden1 + (T - 1) * hidden1 * hidden1
                     + hidden1 * hidden2 + hidden2 * O)
    transcendentals = B * (T * hidden1 + O)
    bytes_accessed = 4 * (x.size + slab.size + B * O)

    return pl.pallas_call(
        kern,
        out_shape=jax.ShapeDtypeStruct((B, O), jnp.float32),
        grid_spec=pltpu.PrefetchScalarGridSpec(
            num_scalar_prefetch=0,
            grid=(nb,),
            in_specs=[
                pl.BlockSpec((block_b, T, I), lambda i: (i, 0, 0)),
                pl.BlockSpec(slab.shape, lambda i: (0, 0)),
            ],
            out_specs=pl.BlockSpec((block_b, O), lambda i: (i, 0)),
        ),
        compiler_params=pltpu.CompilerParams(dimension_semantics=("parallel",)),
        cost_estimate=pl.CostEstimate(flops=flops,
                                      transcendentals=transcendentals,
                                      bytes_accessed=bytes_accessed),
    )(x, slab)


def ref_forward(x, wih, whh, brnn, w1, b1, w2, b2):
    """Pure-JAX reference matching PyTorch semantics (eval mode, f32)."""
    B, T, I = x.shape
    H1 = wih.shape[1]
    h = jnp.zeros((B, H1), jnp.float32)
    for t in range(T):
        h = jnp.tanh(jnp.dot(x[:, t, :], wih, precision=HIGH)
                     + jnp.dot(h, whh, precision=HIGH) + brnn)
    z1 = jnp.dot(h, w1, precision=HIGH) + b1
    a1 = jnp.where(z1 >= 0, z1, 0.05 * z1)
    z2 = jnp.dot(a1, w2, precision=HIGH) + b2
    return jax.nn.sigmoid(z2)


if __name__ == "__main__":
    # Module hyperparameters (small, consistent with the forward pass).
    INPUT, OUTPUT, MID1, MID2 = 16, 8, 32, 32
    B, T = 8, 8

    key = jax.random.PRNGKey(0)
    ks = jax.random.split(key, 9)

    def uinit(k, shape, fan):
        bound = 1.0 / jnp.sqrt(jnp.float32(fan))
        return jax.random.uniform(k, shape, jnp.float32, -bound, bound)

    # nn.RNN params (stored pre-transposed: (in, out)); combined bias b_ih + b_hh.
    wih = uinit(ks[0], (INPUT, MID1), MID1)
    whh = uinit(ks[1], (MID1, MID1), MID1)
    brnn = uinit(ks[2], (1, MID1), MID1) + uinit(ks[3], (1, MID1), MID1)
    # nn.Linear params (pre-transposed).
    w1 = uinit(ks[4], (MID1, MID2), MID1)
    b1 = uinit(ks[5], (1, MID2), MID1)
    w2 = uinit(ks[6], (MID2, OUTPUT), MID2)
    b2 = uinit(ks[7], (1, OUTPUT), MID2)

    x = jax.random.normal(ks[8], (B, T, INPUT), jnp.float32)

    # One-time parameter packing into a lane-dense slab (amortized across calls).
    slab = jax.block_until_ready(pack_params(wih, whh, brnn, w1, b1, w2, b2))

    out = rnn_forward(x, slab, in_dim=INPUT, hidden1=MID1, hidden2=MID2,
                      out_dim=OUTPUT)
    out = jax.block_until_ready(out)

    ref = ref_forward(x, wih, whh, brnn, w1, b1, w2, b2)
    assert out.shape == (B, OUTPUT)
    assert jnp.allclose(out, ref, atol=1e-5, rtol=1e-5), "mismatch vs JAX reference"

    print("KERNEL_OK")
</pallas_src>

<mosaic_0001>
module attributes {stable_mosaic.version = 11 : i64} {
  func.func @rnn_mlp_kernel(%arg0: i32, %arg1: memref<8x8x16xf32, #tpu.memory_space<vmem>>, %arg2: memref<40x128xf32, #tpu.memory_space<vmem>>, %arg3: memref<8x8xf32, #tpu.memory_space<vmem>>) attributes {dimension_semantics = [#tpu.dimension_semantics<parallel>], iteration_bounds = array<i64: 1>, scalar_prefetch = 0 : i64, scratch_operands = 0 : i64, tpu.core_type = #tpu.core_type<tc>, window_params = [{transform_indices = @transform_0, window_bounds = array<i64: 8, 8, 16>}, {pipeline_mode = #tpu.pipeline_mode<synchronous>, transform_indices = @transform_1, window_bounds = array<i64: 40, 128>}, {transform_indices = @transform_2, window_bounds = array<i64: 8, 8>}]} {
    %c0 = arith.constant 0 : index
    %c0_0 = arith.constant 0 : index
    %0 = vector.load %arg2[%c0, %c0_0] : memref<40x128xf32, #tpu.memory_space<vmem>>, vector<16x32xf32>
    %c0_1 = arith.constant 0 : index
    %c32 = arith.constant 32 : index
    %1 = vector.load %arg2[%c0_1, %c32] : memref<40x128xf32, #tpu.memory_space<vmem>>, vector<32x32xf32>
    %c0_2 = arith.constant 0 : index
    %c64 = arith.constant 64 : index
    %2 = vector.load %arg2[%c0_2, %c64] : memref<40x128xf32, #tpu.memory_space<vmem>>, vector<32x32xf32>
    %c0_3 = arith.constant 0 : index
    %c96 = arith.constant 96 : index
    %3 = vector.load %arg2[%c0_3, %c96] : memref<40x128xf32, #tpu.memory_space<vmem>>, vector<32x8xf32>
    %c32_4 = arith.constant 32 : index
    %c0_5 = arith.constant 0 : index
    %4 = vector.load %arg2[%c32_4, %c0_5] : memref<40x128xf32, #tpu.memory_space<vmem>>, vector<1x32xf32>
    %c32_6 = arith.constant 32 : index
    %c32_7 = arith.constant 32 : index
    %5 = vector.load %arg2[%c32_6, %c32_7] : memref<40x128xf32, #tpu.memory_space<vmem>>, vector<1x32xf32>
    %c32_8 = arith.constant 32 : index
    %c64_9 = arith.constant 64 : index
    %6 = vector.load %arg2[%c32_8, %c64_9] : memref<40x128xf32, #tpu.memory_space<vmem>>, vector<1x8xf32>
    %c0_10 = arith.constant 0 : index
    %c0_11 = arith.constant 0 : index
    %c0_12 = arith.constant 0 : index
    %7 = vector.load %arg1[%c0_10, %c0_11, %c0_12] : memref<8x8x16xf32, #tpu.memory_space<vmem>>, vector<8x8x16xf32>
    %8 = vector.extract_strided_slice %7 {offsets = [0, 0, 0], sizes = [8, 1, 16], strides = [1, 1, 1]} : vector<8x8x16xf32> to vector<8x1x16xf32>
    %9 = vector.shape_cast %8 : vector<8x1x16xf32> to vector<8x16xf32>
    %cst = arith.constant dense<0.000000e+00> : vector<8x32xf32>
    %10 = tpu.matmul %9, %0, %cst {dimension_numbers = #tpu.dot_dimension_numbers<[1], [0], [0], [1], [0, 0, 1, 1], [], []>, precision = #tpu.contract_precision<fp32>} : vector<8x16xf32>, vector<16x32xf32>, vector<8x32xf32> -> vector<8x32xf32>
    %11 = vector.broadcast %4 : vector<1x32xf32> to vector<8x32xf32>
    %12 = arith.addf %10, %11 : vector<8x32xf32>
    %13 = vector.extract_strided_slice %7 {offsets = [0, 1, 0], sizes = [8, 1, 16], strides = [1, 1, 1]} : vector<8x8x16xf32> to vector<8x1x16xf32>
    %14 = vector.shape_cast %13 : vector<8x1x16xf32> to vector<8x16xf32>
    %cst_13 = arith.constant dense<0.000000e+00> : vector<8x32xf32>
    %15 = tpu.matmul %14, %0, %cst_13 {dimension_numbers = #tpu.dot_dimension_numbers<[1], [0], [0], [1], [0, 0, 1, 1], [], []>, precision = #tpu.contract_precision<fp32>} : vector<8x16xf32>, vector<16x32xf32>, vector<8x32xf32> -> vector<8x32xf32>
    %16 = vector.broadcast %4 : vector<1x32xf32> to vector<8x32xf32>
    %17 = arith.addf %15, %16 : vector<8x32xf32>
    %18 = vector.extract_strided_slice %7 {offsets = [0, 2, 0], sizes = [8, 1, 16], strides = [1, 1, 1]} : vector<8x8x16xf32> to vector<8x1x16xf32>
    %19 = vector.shape_cast %18 : vector<8x1x16xf32> to vector<8x16xf32>
    %cst_14 = arith.constant dense<0.000000e+00> : vector<8x32xf32>
    %20 = tpu.matmul %19, %0, %cst_14 {dimension_numbers = #tpu.dot_dimension_numbers<[1], [0], [0], [1], [0, 0, 1, 1], [], []>, precision = #tpu.contract_precision<fp32>} : vector<8x16xf32>, vector<16x32xf32>, vector<8x32xf32> -> vector<8x32xf32>
    %21 = vector.broadcast %4 : vector<1x32xf32> to vector<8x32xf32>
    %22 = arith.addf %20, %21 : vector<8x32xf32>
    %23 = vector.extract_strided_slice %7 {offsets = [0, 3, 0], sizes = [8, 1, 16], strides = [1, 1, 1]} : vector<8x8x16xf32> to vector<8x1x16xf32>
    %24 = vector.shape_cast %23 : vector<8x1x16xf32> to vector<8x16xf32>
    %cst_15 = arith.constant dense<0.000000e+00> : vector<8x32xf32>
    %25 = tpu.matmul %24, %0, %cst_15 {dimension_numbers = #tpu.dot_dimension_numbers<[1], [0], [0], [1], [0, 0, 1, 1], [], []>, precision = #tpu.contract_precision<fp32>} : vector<8x16xf32>, vector<16x32xf32>, vector<8x32xf32> -> vector<8x32xf32>
    %26 = vector.broadcast %4 : vector<1x32xf32> to vector<8x32xf32>
    %27 = arith.addf %25, %26 : vector<8x32xf32>
    %28 = vector.extract_strided_slice %7 {offsets = [0, 4, 0], sizes = [8, 1, 16], strides = [1, 1, 1]} : vector<8x8x16xf32> to vector<8x1x16xf32>
    %29 = vector.shape_cast %28 : vector<8x1x16xf32> to vector<8x16xf32>
    %cst_16 = arith.constant dense<0.000000e+00> : vector<8x32xf32>
    %30 = tpu.matmul %29, %0, %cst_16 {dimension_numbers = #tpu.dot_dimension_numbers<[1], [0], [0], [1], [0, 0, 1, 1], [], []>, precision = #tpu.contract_precision<fp32>} : vector<8x16xf32>, vector<16x32xf32>, vector<8x32xf32> -> vector<8x32xf32>
    %31 = vector.broadcast %4 : vector<1x32xf32> to vector<8x32xf32>
    %32 = arith.addf %30, %31 : vector<8x32xf32>
    %33 = vector.extract_strided_slice %7 {offsets = [0, 5, 0], sizes = [8, 1, 16], strides = [1, 1, 1]} : vector<8x8x16xf32> to vector<8x1x16xf32>
    %34 = vector.shape_cast %33 : vector<8x1x16xf32> to vector<8x16xf32>
    %cst_17 = arith.constant dense<0.000000e+00> : vector<8x32xf32>
    %35 = tpu.matmul %34, %0, %cst_17 {dimension_numbers = #tpu.dot_dimension_numbers<[1], [0], [0], [1], [0, 0, 1, 1], [], []>, precision = #tpu.contract_precision<fp32>} : vector<8x16xf32>, vector<16x32xf32>, vector<8x32xf32> -> vector<8x32xf32>
    %36 = vector.broadcast %4 : vector<1x32xf32> to vector<8x32xf32>
    %37 = arith.addf %35, %36 : vector<8x32xf32>
    %38 = vector.extract_strided_slice %7 {offsets = [0, 6, 0], sizes = [8, 1, 16], strides = [1, 1, 1]} : vector<8x8x16xf32> to vector<8x1x16xf32>
    %39 = vector.shape_cast %38 : vector<8x1x16xf32> to vector<8x16xf32>
    %cst_18 = arith.constant dense<0.000000e+00> : vector<8x32xf32>
    %40 = tpu.matmul %39, %0, %cst_18 {dimension_numbers = #tpu.dot_dimension_numbers<[1], [0], [0], [1], [0, 0, 1, 1], [], []>, precision = #tpu.contract_precision<fp32>} : vector<8x16xf32>, vector<16x32xf32>, vector<8x32xf32> -> vector<8x32xf32>
    %41 = vector.broadcast %4 : vector<1x32xf32> to vector<8x32xf32>
    %42 = arith.addf %40, %41 : vector<8x32xf32>
    %43 = vector.extract_strided_slice %7 {offsets = [0, 7, 0], sizes = [8, 1, 16], strides = [1, 1, 1]} : vector<8x8x16xf32> to vector<8x1x16xf32>
    %44 = vector.shape_cast %43 : vector<8x1x16xf32> to vector<8x16xf32>
    %cst_19 = arith.constant dense<0.000000e+00> : vector<8x32xf32>
    %45 = tpu.matmul %44, %0, %cst_19 {dimension_numbers = #tpu.dot_dimension_numbers<[1], [0], [0], [1], [0, 0, 1, 1], [], []>, precision = #tpu.contract_precision<fp32>} : vector<8x16xf32>, vector<16x32xf32>, vector<8x32xf32> -> vector<8x32xf32>
    %46 = vector.broadcast %4 : vector<1x32xf32> to vector<8x32xf32>
    %47 = arith.addf %45, %46 : vector<8x32xf32>
    %48 = math.tanh %12 : vector<8x32xf32>
    %cst_20 = arith.constant dense<0.000000e+00> : vector<8x32xf32>
    %49 = tpu.matmul %48, %1, %cst_20 {dimension_numbers = #tpu.dot_dimension_numbers<[1], [0], [0], [1], [0, 0, 1, 1], [], []>, precision = #tpu.contract_precision<fp32>} : vector<8x32xf32>, vector<32x32xf32>, vector<8x32xf32> -> vector<8x32xf32>
    %50 = arith.addf %17, %49 : vector<8x32xf32>
    %51 = math.tanh %50 : vector<8x32xf32>
    %cst_21 = arith.constant dense<0.000000e+00> : vector<8x32xf32>
    %52 = tpu.matmul %51, %1, %cst_21 {dimension_numbers = #tpu.dot_dimension_numbers<[1], [0], [0], [1], [0, 0, 1, 1], [], []>, precision = #tpu.contract_precision<fp32>} : vector<8x32xf32>, vector<32x32xf32>, vector<8x32xf32> -> vector<8x32xf32>
    %53 = arith.addf %22, %52 : vector<8x32xf32>
    %54 = math.tanh %53 : vector<8x32xf32>
    %cst_22 = arith.constant dense<0.000000e+00> : vector<8x32xf32>
    %55 = tpu.matmul %54, %1, %cst_22 {dimension_numbers = #tpu.dot_dimension_numbers<[1], [0], [0], [1], [0, 0, 1, 1], [], []>, precision = #tpu.contract_precision<fp32>} : vector<8x32xf32>, vector<32x32xf32>, vector<8x32xf32> -> vector<8x32xf32>
    %56 = arith.addf %27, %55 : vector<8x32xf32>
    %57 = math.tanh %56 : vector<8x32xf32>
    %cst_23 = arith.constant dense<0.000000e+00> : vector<8x32xf32>
    %58 = tpu.matmul %57, %1, %cst_23 {dimension_numbers = #tpu.dot_dimension_numbers<[1], [0], [0], [1], [0, 0, 1, 1], [], []>, precision = #tpu.contract_precision<fp32>} : vector<8x32xf32>, vector<32x32xf32>, vector<8x32xf32> -> vector<8x32xf32>
    %59 = arith.addf %32, %58 : vector<8x32xf32>
    %60 = math.tanh %59 : vector<8x32xf32>
    %cst_24 = arith.constant dense<0.000000e+00> : vector<8x32xf32>
    %61 = tpu.matmul %60, %1, %cst_24 {dimension_numbers = #tpu.dot_dimension_numbers<[1], [0], [0], [1], [0, 0, 1, 1], [], []>, precision = #tpu.contract_precision<fp32>} : vector<8x32xf32>, vector<32x32xf32>, vector<8x32xf32> -> vector<8x32xf32>
    %62 = arith.addf %37, %61 : vector<8x32xf32>
    %63 = math.tanh %62 : vector<8x32xf32>
    %cst_25 = arith.constant dense<0.000000e+00> : vector<8x32xf32>
    %64 = tpu.matmul %63, %1, %cst_25 {dimension_numbers = #tpu.dot_dimension_numbers<[1], [0], [0], [1], [0, 0, 1, 1], [], []>, precision = #tpu.contract_precision<fp32>} : vector<8x32xf32>, vector<32x32xf32>, vector<8x32xf32> -> vector<8x32xf32>
    %65 = arith.addf %42, %64 : vector<8x32xf32>
    %66 = math.tanh %65 : vector<8x32xf32>
    %cst_26 = arith.constant dense<0.000000e+00> : vector<8x32xf32>
    %67 = tpu.matmul %66, %1, %cst_26 {dimension_numbers = #tpu.dot_dimension_numbers<[1], [0], [0], [1], [0, 0, 1, 1], [], []>, precision = #tpu.contract_precision<fp32>} : vector<8x32xf32>, vector<32x32xf32>, vector<8x32xf32> -> vector<8x32xf32>
    %68 = arith.addf %47, %67 : vector<8x32xf32>
    %69 = math.tanh %68 : vector<8x32xf32>
    %cst_27 = arith.constant dense<0.000000e+00> : vector<8x32xf32>
    %70 = tpu.matmul %69, %2, %cst_27 {dimension_numbers = #tpu.dot_dimension_numbers<[1], [0], [0], [1], [0, 0, 1, 1], [], []>, precision = #tpu.contract_precision<fp32>} : vector<8x32xf32>, vector<32x32xf32>, vector<8x32xf32> -> vector<8x32xf32>
    %71 = vector.broadcast %5 : vector<1x32xf32> to vector<8x32xf32>
    %72 = arith.addf %70, %71 : vector<8x32xf32>
    %cst_28 = arith.constant 0.000000e+00 : f32
    %73 = vector.broadcast %cst_28 : f32 to vector<8x32xf32>
    %74 = arith.cmpf oge, %72, %73 : vector<8x32xf32>
    %cst_29 = arith.constant 5.000000e-02 : f32
    %75 = vector.broadcast %cst_29 : f32 to vector<8x32xf32>
    %76 = arith.mulf %75, %72 : vector<8x32xf32>
    %77 = arith.select %74, %72, %76 : vector<8x32xi1>, vector<8x32xf32>
    %cst_30 = arith.constant dense<0.000000e+00> : vector<8x8xf32>
    %78 = tpu.matmul %77, %3, %cst_30 {dimension_numbers = #tpu.dot_dimension_numbers<[1], [0], [0], [1], [0, 0, 1, 1], [], []>, precision = #tpu.contract_precision<fp32>} : vector<8x32xf32>, vector<32x8xf32>, vector<8x8xf32> -> vector<8x8xf32>
    %79 = vector.broadcast %6 : vector<1x8xf32> to vector<8x8xf32>
    %80 = arith.addf %78, %79 : vector<8x8xf32>
    %81 = arith.negf %80 : vector<8x8xf32>
    %82 = math.exp %81 : vector<8x8xf32>
    %cst_31 = arith.constant 1.000000e+00 : f32
    %83 = vector.broadcast %cst_31 : f32 to vector<8x8xf32>
    %84 = arith.addf %83, %82 : vector<8x8xf32>
    %85 = arith.divf %83, %84 : vector<8x8xf32>
    %c0_32 = arith.constant 0 : index
    %c0_33 = arith.constant 0 : index
    %86 = vector.load %arg3[%c0_32, %c0_33] : memref<8x8xf32, #tpu.memory_space<vmem>>, vector<8x8xf32>
    tpu.vector_store %arg3[%c0_32, %c0_33], %85 {strides = array<i32>} : memref<8x8xf32, #tpu.memory_space<vmem>>, vector<8x8xf32>,
    return
  }
  func.func @transform_0(%arg0: i32) -> (i32, i32, i32) {
    %c0_i32 = arith.constant 0 : i32
    %c0_i32_0 = arith.constant 0 : i32
    %c0_i32_1 = arith.constant 0 : i32
    return %arg0, %c0_i32, %c0_i32_0 : i32, i32, i32
  }
  func.func @transform_1(%arg0: i32) -> (i32, i32) {
    %c0_i32 = arith.constant 0 : i32
    %c0_i32_0 = arith.constant 0 : i32
    %c0_i32_1 = arith.constant 0 : i32
    return %c0_i32, %c0_i32_0 : i32, i32
  }
  func.func @transform_2(%arg0: i32) -> (i32, i32) {
    %c0_i32 = arith.constant 0 : i32
    %c0_i32_0 = arith.constant 0 : i32
    return %arg0, %c0_i32 : i32, i32
  }
}

</mosaic_0001>

<bundles_post_ra>
// kernel: rnn_forward.1
= control target key start
LH: loop header
LB: loop body
LE: loop exit
PB: predicated region body
PF: predicated region fallthrough
CT: control target
= control target key end

     0   :  { %7 = vsyncpa [#allocation3], 0  ;;  %s11399_s0 = inlined_call_operand.hbm [shape: f32[8,8,16], index: 0, kind: input, shape index: {}]   ;;  %s11400_s1 = inlined_call_operand.hbm [shape: f32[40,128], index: 1, kind: input, shape index: {}]   ;;  %s11401_s2 = inlined_call_operand.hbm [shape: f32[8,8], index: 2, kind: output, shape index: {}]  }
   0x1   :  { %8 = vsyncpa [#allocation6], 0 }
   0x2   :  { %9 = vsyncpa [#allocation4], 0  ;;  %s10468_s9 = smov [#allocation2]   ;;  %s10396_s13 = scalar_lea.hbm %s11399_s0, 1024 }
   0x3   :  { %s15_s10 = sshll.u32 %s10468_s9, 4  ;;  %p10397_p0 = scmp.ne.s32.totalorder %s11399_s0, %s10396_s13  ;;  %s16_s10 = int_to_ptr.vmem [resolvable:$true] %s15_s10 }
   0x4   :  { %p10400_p1 = scmp.lt.u32.totalorder %s10396_s13, %s11399_s0 }
   0x6   :  { %p10402_p2 = pnand %p10400_p1, %p10397_p0 }
   0x8   :  { %10405 = shalt.err (!%p10402_p2)
}
   0x9   :  { %s10406_s18 = scalar_lea.vmem %s16_s10, 1024  ;;  %p10411_p4 = scmp.lt.s32.totalorder %s16_s10, %s16_s10 }
   0xa   :  { %p10407_p3 = scmp.ne.s32.totalorder %s16_s10, %s10406_s18  ;;  %p10412_p5 = scmp.lt.s32.totalorder %s10406_s18, %s10406_s18 }
   0xc   :  { %p10413_p6 = por %p10412_p5, %p10411_p4 }
   0xe   :  { %p10414_p7 = pnand %p10413_p6, %p10407_p3 }
  0x10   :  { %10417 = shalt.err (!%p10414_p7)
}
  0x11   :  { %s10469_s19 = smov 128   ;;  %s10470_s20 = smov 8  }
  0x12   :  { %21 = dma.hbm_to_vmem [thread:$0]  %s11399_s0, 1024, %s16_s10, [#allocation3], %s10469_s19, %s10469_s19, %s10470_s20  }
  0x13   :  { %s10471_s23 = smov [#allocation5]   ;;  %s10418_s27 = scalar_lea.hbm %s11400_s1, 640 }
  0x14   :  { %s27_s24 = sshll.u32 %s10471_s23, 4  ;;  %p10419_p8 = scmp.ne.s32.totalorder %s11400_s1, %s10418_s27  ;;  %s28_s24 = int_to_ptr.vmem [resolvable:$true] %s27_s24 }
  0x15   :  { %p10422_p9 = scmp.lt.u32.totalorder %s10418_s27, %s11400_s1 }
  0x17   :  { %p10424_p10 = pnand %p10422_p9, %p10419_p8 }
  0x19   :  { %10427 = shalt.err (!%p10424_p10)
}
  0x1a   :  { %s10428_s4 = scalar_lea.vmem %s28_s24, 640  ;;  %p10433_p12 = scmp.lt.s32.totalorder %s28_s24, %s28_s24 }
  0x1b   :  { %p10429_p11 = scmp.ne.s32.totalorder %s28_s24, %s10428_s4  ;;  %p10434_p13 = scmp.lt.s32.totalorder %s10428_s4, %s10428_s4 }
  0x1d   :  { %p10435_p0 = por %p10434_p13, %p10433_p12 }
  0x1f   :  { %p10436_p1 = pnand %p10435_p0, %p10429_p11 }
  0x21   :  { %10439 = shalt.err (!%p10436_p1)
}
  0x22   :  { %33 = dma.hbm_to_vmem [thread:$0]  %s11400_s1, 640, %s28_s24, [#allocation6], %s10469_s19, %s10469_s19, %s10470_s20  }
  0x23   :  { %10462 = dma.done.wait [#allocation3], 1024  }
  0x24   :  { %10463 = vsyncadd [#allocation3], 4294966272 }
  0x25   :  { %10464 = dma.done.wait [#allocation6], 640  }
  0x26   :  { %10465 = vsyncadd [#allocation6], 4294966656  ;;  %v10472_v0 = vmov 0.0|0.0   ;;  %vm10473_vm0 = vmmov 0   ;;  %v10474_v1 = vmov 0.0   ;;  %vm66_vm1 = vcmask 1041409  }
  0x27   :  { %9701 = vmatprep.subr.bf16.mxu0 %v10472_v0  ;;  %8775 = vmatprep.mubr.msk.f32.mxu0 %vm10473_vm0, %v10474_v1  ;;  %vm69_vm2 = vcmask 1042434   ;;  %vm72_vm3 = vcmask 1043459   ;;  %v40_v2 = vld [vmem:[#allocation5] sm:$0xff]  ;;  %v41_v3 = vld [vmem:[#allocation5 + $0x8] sm:$0xff]  ;;  %vm75_vm4 = vcmask 1044484   ;;  %vm78_vm5 = vcmask 1045509  }
  0x28   :  { %9719 = vmatprep.subr.bf16.mxu1 %v10472_v0  ;;  %8817 = vmatprep.mubr.msk.f32.mxu1 %vm10473_vm0, %v10474_v1  ;;  %v10524_v4 = vld [vmem:[#allocation2] sm:$0xff]  ;;  %vm81_vm6 = vcmask 1046534   ;;  %v90_v5 = vand.u32 4294901760, %v40_v2  ;;  %v93_v6 = vand.u32 4294901760, %v41_v3  ;;  %v10526_v7 = vld [vmem:[#allocation2 + $0x8] sm:$0xff]  ;;  %v10528_v8 = vld [vmem:[#allocation2 + $0x10] sm:$0xff] }
  0x29   :  { %v10530_v9 = vld [vmem:[#allocation2 + $0x18] sm:$0xff]  ;;  %v548_v10 = vrot.slane %v10524_v4, 1  ;;  %s10475_s1 = smov 96   ;;  %v10534_v11 = vld [vmem:[#allocation2 + $0x20] sm:$0xff]  ;;  %v10536_v12 = vld [vmem:[#allocation2 + $0x28] sm:$0xff]  ;;  %v65_v14 = vrot.slane %v10526_v7, 7 }
  0x2a   :  { %3878 = vrot.lane.b32.xlu0 %v40_v2, %s10475_s1  ;;  %v10538_v13 = vld [vmem:[#allocation2 + $0x30] sm:$0xff]  ;;  %v68_v15 = vrot.slane %v10528_v8, 6  ;;  %v71_v16 = vrot.slane %v10530_v9, 5  ;;  %v10543_v17 = vpack.c.bf16 %v93_v6, %v90_v5  ;;  %v10545_v18 = vld [vmem:[#allocation2 + $0x38] sm:$0xff]  ;;  %v74_v19 = vrot.slane %v10534_v11, 4  ;;  %s10476_s6 = smov 64  }
  0x2b   :  { %v77_v20 = vrot.slane %v10536_v12, 3  ;;  %vm84_vm7 = vcmask 1047559   ;;  %v42_v21 = vld [vmem:[#allocation5 + $0x10] sm:$0xff]  ;;  %v67_v22 = vsel %vm66_vm1, %v65_v14, %v10524_v4  ;;  %v80_v23 = vrot.slane %v10538_v13, 2  ;;  %v43_v30 = vld [vmem:[#allocation5 + $0x18] sm:$0xff]  ;;  %s10477_s7 = smov 32  }
  0x2c   :  { %v10552_v24 = vsub.f32 %v40_v2, %v90_v5  ;;  %v10554_v25 = vsub.f32 %v41_v3, %v93_v6  ;;  %3882 = vrot.lane.b32.xlu1 %v42_v21, %s10475_s1  ;;  %9703 = vmatpush3.bf16.msra.mxu0 %v10543_v17  ;;  %v70_v26 = vsel %vm69_vm2, %v68_v15, %v67_v22  ;;  %v550_v28 = vrot.slane %v10528_v8, 7  ;;  %s10478_s8 = smov [#allocation7]  }
  0x2d   :  { %9721 = vmatpush3.bf16.msra.mxu1 %v10543_v17  ;;  %v549_v27 = vsel %vm66_vm1, %v10526_v7, %v548_v10  ;;  %v552_v29 = vrot.slane %v10530_v9, 6  ;;  %9704 = vmatprep.subr.bf16.mxu0 %v10472_v0  ;;  %v73_v31 = vsel %vm72_vm3, %v71_v16, %v70_v26  ;;  %v83_v32 = vrot.slane %v10545_v18, 1  ;;  %s8345_s9 = sshll.u32 %s10478_s8, 4  ;;  %s8346_s9 = int_to_ptr.vmem [resolvable:$true] %s8345_s9 }
  0x2e   :  { %v169_v33 = vand.u32 4294901760, %v10552_v24  ;;  %v176_v34 = vand.u32 4294901760, %v10554_v25  ;;  %9722 = vmatprep.subr.bf16.mxu1 %v10472_v0  ;;  %v76_v35 = vsel %vm75_vm4, %v74_v19, %v73_v31  ;;  %v551_v36 = vsel %vm69_vm2, %v550_v28, %v549_v27  ;;  %3880 = vrot.lane.b32.xlu0 %v41_v3, %s10475_s1  ;;  %s10440_s10 = scalar_lea.vmem %s8346_s9, 128  ;;  %p10445_p3 = scmp.lt.s32.totalorder %s8346_s9, %s8346_s9 }
  0x2f   :  { %v554_v37 = vrot.slane %v10534_v11, 5  ;;  %v556_v38 = vrot.slane %v10536_v12, 4  ;;  %v79_v39 = vsel %vm78_vm5, %v77_v20, %v76_v35  ;;  %vm86_vm8 = vcmask 130048   ;;  %p10441_p2 = scmp.ne.s32.totalorder %s8346_s9, %s10440_s10  ;;  %p10446_p4 = scmp.lt.s32.totalorder %s10440_s10, %s10440_s10 }
  0x30   :  { %3884 = vrot.lane.b32.xlu1 %v43_v30, %s10475_s1  ;;  %v82_v40 = vsel %vm81_vm6, %v80_v23, %v79_v39  ;;  %v553_v41 = vsel %vm72_vm3, %v552_v29, %v551_v36  ;;  %v558_v42 = vrot.slane %v10538_v13, 3  ;;  %v560_v43 = vrot.slane %v10545_v18, 2 }
  0x31   :  { %v85_v44 = vsel %vm84_vm7, %v83_v32, %v82_v40  ;;  %v555_v45 = vsel %vm75_vm4, %v554_v37, %v553_v41  ;;  %v170_v47 = vsub.f32 %v10552_v24, %v169_v33  ;;  %v177_v48 = vsub.f32 %v10554_v25, %v176_v34  ;;  %p10447_p5 = por %p10446_p4, %p10445_p3 }
  0x32   :  { %v87_v46 = vsel %vm86_vm8, %v85_v44, 0  ;;  %v557_v49 = vsel %vm78_vm5, %v556_v38, %v555_v45  ;;  %v1023_v53 = vrot.slane %v10524_v4, 2  ;;  %v1024_v54 = vrot.slane %v10526_v7, 1 }
  0x33   :  { %v10591_v50 = vand.u32 4294901760, %v87_v46  ;;  %v559_v51 = vsel %vm81_vm6, %v558_v42, %v557_v49  ;;  %v171_v57 = vand.u32 4294901760, %v170_v47  ;;  %v178_v58 = vand.u32 4294901760, %v177_v48  ;;  %p10448_p6 = pnand %p10447_p5, %p10441_p2 }
  0x34   :  { %v561_v52 = vsel %vm84_vm7, %v560_v43, %v559_v51  ;;  %v1025_v62 = vsel %vm66_vm1, %v1024_v54, %v1023_v53  ;;  %v1027_v10 = vrot.slane %v10530_v9, 7  ;;  %v1973_v14 = vrot.slane %v10524_v4, 4 }
  0x35   :  { %v10598_v55 = vsub.f32 %v87_v46, %v10591_v50  ;;  %v562_v56 = vsel %vm86_vm8, %v561_v52, 0  ;;  %v10611_v2 = vpack.c.bf16 %v178_v58, %v171_v57  ;;  %v1026_v6 = vsel %vm69_vm2, %v10528_v8, %v1025_v62 }
  0x36   :  { %v10601_v59 = vand.u32 4294901760, %v562_v56  ;;  %v1498_v16 = vrot.slane %v10524_v4, 3  ;;  %v1499_v19 = vrot.slane %v10526_v7, 2  ;;  %v1974_v20 = vrot.slane %v10526_v7, 3 }
  0x37   :  { %v158_v60 = vand.u32 4294901760, %v10598_v55  ;;  %v10626_v21 = vpack.c.bf16 %v10554_v25, %v10552_v24  ;;  %v1976_v22 = vrot.slane %v10528_v8, 2  ;;  %v1978_v23 = vrot.slane %v10530_v9, 1 }
  0x38   :  { %v10605_v61 = vsub.f32 %v562_v56, %v10601_v59  ;;  %v1029_v27 = vrot.slane %v10534_v11, 6  ;;  %v1975_v28 = vsel %vm66_vm1, %v1974_v20, %v1973_v14  ;;  %v1981_v29 = vrot.slane %v10536_v12, 7 }
  0x39   :  { %v159_v63 = vsub.f32 %v10598_v55, %v158_v60  ;;  %v1028_v30 = vsel %vm72_vm3, %v1027_v10, %v1026_v6  ;;  %v1501_v31 = vrot.slane %v10528_v8, 1  ;;  %v1977_v32 = vsel %vm69_vm2, %v1976_v22, %v1975_v28 }
  0x3a   :  { %v633_v3 = vand.u32 4294901760, %v10605_v61  ;;  %v1983_v35 = vrot.slane %v10538_v13, 6  ;;  %v1500_v36 = vsel %vm66_vm1, %v1499_v19, %v1498_v16  ;;  %v1979_v37 = vsel %vm72_vm3, %v1978_v23, %v1977_v32 }
  0x3b   :  { %v160_v5 = vand.u32 4294901760, %v159_v63  ;;  %v1985_v38 = vrot.slane %v10545_v18, 5  ;;  %v2448_v39 = vrot.slane %v10524_v4, 5  ;;  %v1031_v40 = vrot.slane %v10536_v12, 5 }
  0x3c   :  { %v634_v15 = vsub.f32 %v10605_v61, %v633_v3  ;;  %v1980_v41 = vsel %vm75_vm4, %v10534_v11, %v1979_v37  ;;  %v2449_v42 = vrot.slane %v10526_v7, 4  ;;  %v2451_v43 = vrot.slane %v10528_v8, 3 }
  0x3d   :  { %8776 = vmatmul.mubr.f32.vlgmr.msra.gmra.mrb[0].mxu0 %v160_v5  ;;  %v1033_v44 = vrot.slane %v10538_v13, 4  ;;  %v1982_v45 = vsel %vm78_vm5, %v1981_v29, %v1980_v41  ;;  %v2453_v46 = vrot.slane %v10530_v9, 2  ;;  %v2455_v47 = vrot.slane %v10534_v11, 1 }
  0x3e   :  { %9706 = vmatpush3.bf16.msra.mxu0 %v10611_v2  ;;  %8782 = vmatprep.mubr.msk.f32.mxu0 %vm10473_vm0, %v10474_v1  ;;  %v635_v26 = vand.u32 4294901760, %v634_v15  ;;  %v1030_v48 = vsel %vm75_vm4, %v1029_v27, %v1028_v30  ;;  %v1502_v49 = vsel %vm69_vm2, %v1501_v31, %v1500_v36  ;;  %v1984_v51 = vsel %vm81_vm6, %v1983_v35, %v1982_v45 }
  0x3f   :  { %9707 = vmatprep.subr.bf16.mxu0 %v10472_v0  ;;  %v2450_v52 = vsel %vm66_vm1, %v2449_v42, %v2448_v39  ;;  %v1504_v53 = vrot.slane %v10534_v11, 7  ;;  %v1986_v54 = vsel %vm84_vm7, %v1985_v38, %v1984_v51  ;;  %v2458_v57 = vrot.slane %v10538_v13, 7 }
  0x40   :  { %8818 = vmatmul.mubr.f32.vlgmr.msra.gmra.mrb[0].mxu1 %v635_v26  ;;  %v2452_v56 = vsel %vm69_vm2, %v2451_v43, %v2450_v52  ;;  %v10668_v58 = vsel %vm86_vm8, %v1986_v54, 0  ;;  %v2460_v63 = vrot.slane %v10545_v18, 6  ;;  %v2923_v5 = vrot.slane %v10524_v4, 6 }
  0x41   :  { %9724 = vmatpush3.bf16.msra.mxu1 %v10611_v2  ;;  %8824 = vmatprep.mubr.msk.f32.mxu1 %vm10473_vm0, %v10474_v1  ;;  %v2454_v62 = vsel %vm72_vm3, %v2453_v46, %v2452_v56  ;;  %v1503_v6 = vsel %vm72_vm3, %v10530_v9, %v1502_v49  ;;  %v2924_v14 = vrot.slane %v10526_v7, 5  ;;  %v2926_v15 = vrot.slane %v10528_v8, 4 }
  0x42   :  { %9725 = vmatprep.subr.bf16.mxu1 %v10472_v0  ;;  %v2456_v10 = vsel %vm75_vm4, %v2455_v47, %v2454_v62  ;;  %v1032_v16 = vsel %vm78_vm5, %v1031_v40, %v1030_v48  ;;  %v2928_v20 = vrot.slane %v10530_v9, 3  ;;  %v2930_v22 = vrot.slane %v10534_v11, 2 }
  0x43   :  { %v2457_v19 = vsel %vm78_vm5, %v10536_v12, %v2456_v10  ;;  %v1506_v23 = vrot.slane %v10536_v12, 6  ;;  %v2925_v27 = vsel %vm66_vm1, %v2924_v14, %v2923_v5  ;;  %v2932_v28 = vrot.slane %v10536_v12, 1 }
  0x44   :  { %v2459_v26 = vsel %vm81_vm6, %v2458_v57, %v2457_v19  ;;  %v1035_v29 = vrot.slane %v10545_v18, 3  ;;  %v1505_v30 = vsel %vm75_vm4, %v1504_v53, %v1503_v6  ;;  %v2927_v32 = vsel %vm69_vm2, %v2926_v15, %v2925_v27 }
  0x45   :  { %8783 = vmatmul.mubr.f32.vlgmr.msra.gmra.mrb[0].mxu0 %v10591_v50  ;;  %v2461_v31 = vsel %vm84_vm7, %v2460_v63, %v2459_v26  ;;  %v2929_v36 = vsel %vm72_vm3, %v2928_v20, %v2927_v32  ;;  %v2935_v37 = vrot.slane %v10545_v18, 7  ;;  %v3398_v38 = vrot.slane %v10524_v4, 7 }
  0x46   :  { %9709 = vmatpush3.bf16.msra.mxu0 %v10626_v21  ;;  %8789 = vmatprep.mubr.msk.f32.mxu0 %vm10473_vm0, %v10474_v1  ;;  %v10701_v35 = vsel %vm86_vm8, %v2461_v31, 0  ;;  %v1508_v39 = vrot.slane %v10538_v13, 5  ;;  %v2931_v40 = vsel %vm75_vm4, %v2930_v22, %v2929_v36  ;;  %v3399_v41 = vrot.slane %v10526_v7, 6 }
  0x47   :  { %9710 = vmatprep.subr.bf16.mxu0 %v10472_v0  ;;  %v3401_v42 = vrot.slane %v10528_v8, 5  ;;  %v1507_v43 = vsel %vm78_vm5, %v1506_v23, %v1505_v30  ;;  %v2933_v45 = vsel %vm78_vm5, %v2932_v28, %v2931_v40  ;;  %v3403_v46 = vrot.slane %v10530_v9, 4 }
  0x48   :  { %8825 = vmatmul.mubr.f32.vlgmr.msra.gmra.mrb[0].mxu1 %v10601_v59  ;;  %v3405_v47 = vrot.slane %v10534_v11, 3  ;;  %v1034_v4 = vsel %vm81_vm6, %v1033_v44, %v1032_v16  ;;  %v2934_v48 = vsel %vm81_vm6, %v10538_v13, %v2933_v45  ;;  %v3400_v49 = vsel %vm66_vm1, %v3399_v41, %v3398_v38 }
  0x49   :  { %9727 = vmatpush3.bf16.msra.mxu1 %v10626_v21  ;;  %8831 = vmatprep.mubr.msk.f32.mxu1 %vm10473_vm0, %v10474_v1  ;;  %v3407_v7 = vrot.slane %v10536_v12, 2  ;;  %v1510_v8 = vrot.slane %v10545_v18, 4  ;;  %v2936_v9 = vsel %vm84_vm7, %v2935_v37, %v2934_v48  ;;  %v3402_v11 = vsel %vm69_vm2, %v3401_v42, %v3400_v49 }
  0x4a   :  { %9728 = vmatprep.subr.bf16.mxu1 %v10472_v0  ;;  %v3409_v44 = vrot.slane %v10538_v13, 1  ;;  %v1509_v51 = vsel %vm81_vm6, %v1508_v39, %v1507_v43  ;;  %v10730_v52 = vsel %vm86_vm8, %v2936_v9, 0  ;;  %v3404_v12 = vsel %vm72_vm3, %v3403_v46, %v3402_v11 }
  0x4b   :  { %v1036_v53 = vsel %vm84_vm7, %v1035_v29, %v1034_v4  ;;  %v3406_v54 = vsel %vm75_vm4, %v3405_v47, %v3404_v12  ;;  %v10744_v56 = vpack.c.bf16 %v176_v34, %v169_v33  ;;  %v1511_v57 = vsel %vm84_vm7, %v1510_v8, %v1509_v51 }
  0x4c   :  { %v3408_v13 = vsel %vm78_vm5, %v3407_v7, %v3406_v54  ;;  %v1037_v63 = vsel %vm86_vm8, %v1036_v53, 0  ;;  %v1512_v24 = vsel %vm86_vm8, %v1511_v57, 0  ;;  %v10893_v30 = vand.u32 4294901760, %v10730_v52 }
  0x4d   :  { %8790 = vmatmul.mubr.f32.vlgmr.msra.gmra.mrb[0].mxu0 %v10598_v55  ;;  %v3410_v62 = vsel %vm81_vm6, %v3409_v44, %v3408_v13  ;;  %v10761_v25 = vand.u32 4294901760, %v1037_v63  ;;  %vm3890_vm9 = vcmask 261120   ;;  %vm8337_vm11 = vcmask 64512  }
  0x4e   :  { %9712 = vmatpush3.bf16.msra.mxu0 %v10543_v17  ;;  %8796 = vmatprep.mubr.msk.f32.mxu0 %vm10473_vm0, %v10474_v1  ;;  %v3411_v5 = vsel %vm84_vm7, %v10545_v18, %v3410_v62  ;;  %v10766_v18 = vand.u32 4294901760, %v1512_v24  ;;  %v10908_v32 = vsub.f32 %v10730_v52, %v10893_v30 }
  0x4f   :  { %9713 = vmatprep.subr.bf16.mxu0 %v10472_v0  ;;  %v10753_v6 = vsel %vm86_vm8, %v3411_v5, 0  ;;  %v1107_v33 = vsub.f32 %v1037_v63, %v10761_v25 }
  0x50   :  { %8832 = vmatmul.mubr.f32.vlgmr.msra.gmra.mrb[0].mxu1 %v10605_v61  ;;  %v1582_v34 = vsub.f32 %v1512_v24, %v10766_v18  ;;  %v10900_v31 = vand.u32 4294901760, %v10753_v6  ;;  %v3008_v36 = vand.u32 4294901760, %v10908_v32 }
  0x51   :  { %9730 = vmatpush3.bf16.msra.mxu1 %v10543_v17  ;;  %8838 = vmatprep.mubr.msk.f32.mxu1 %vm10473_vm0, %v10474_v1  ;;  %v1108_v55 = vand.u32 4294901760, %v1107_v33 }
  0x52   :  { %9731 = vmatprep.subr.bf16.mxu1 %v10472_v0  ;;  %v3009_v38 = vsub.f32 %v10908_v32, %v3008_v36 }
  0x53   :  { %v1109_v61 = vsub.f32 %v1107_v33, %v1108_v55 }
  0x54   :  { %v3010_v43 = vand.u32 4294901760, %v3009_v38 }
  0x55   :  { %8797 = vmatmul.mubr.f32.vlgmr.msra.gmra.mrb[0].mxu0 %v158_v60  ;;  %v1583_v60 = vand.u32 4294901760, %v1582_v34  ;;  %v1110_v10 = vand.u32 4294901760, %v1109_v61 }
  0x56   :  { %9715 = vmatpush3.bf16.msra.mxu0 %v10744_v56  ;;  %8803 = vmatprep.mubr.msk.f32.mxu0 %vm10473_vm0, %v10474_v1 }
  0x57   :  { %9716 = vmatprep.subr.bf16.mxu0 %v10472_v0 }
  0x58   :  { %8839 = vmatmul.mubr.f32.vlgmr.msra.gmra.mrb[0].mxu1 %v633_v3  ;;  %v1584_v3 = vsub.f32 %v1582_v34, %v1583_v60 }
  0x59   :  { %9733 = vmatpush3.bf16.msra.mxu1 %v10744_v56  ;;  %8845 = vmatprep.mubr.msk.f32.mxu1 %vm10473_vm0, %v10474_v1 }
  0x5a   :  { %9734 = vmatprep.subr.bf16.mxu1 %v10472_v0  ;;  %v1585_v14 = vand.u32 4294901760, %v1584_v3 }
  0x5d   :  { %8804 = vmatmul.mubr.f32.vlgmr.msra.gmra.mrb[0].mxu0 %v10591_v50 }
  0x5e   :  { %9718 = vmatpush3.bf16.msra.mxu0 %v10543_v17  ;;  %8810 = vmatprep.mubr.msk.f32.mxu0 %vm10473_vm0, %v10474_v1 }
  0x5f   :  { %9737 = vmatprep.subr.bf16.mxu0 %v10472_v0 }
  0x60   :  { %8846 = vmatmul.mubr.f32.vlgmr.msra.gmra.mrb[0].mxu1 %v10601_v59 }
  0x61   :  { %9736 = vmatpush3.bf16.msra.mxu1 %v10543_v17  ;;  %8852 = vmatprep.mubr.msk.f32.mxu1 %vm10473_vm0, %v10474_v1 }
  0x62   :  { %9755 = vmatprep.subr.bf16.mxu1 %v10472_v0 }
  0x65   :  { %8811 = vmatmul.mubr.f32.vlgmr.msra.gmra.mrb[0].mxu0 %v10591_v50  ;;  %v10821_v50 = vand.u32 4294901760, %v10668_v58 }
  0x66   :  { %9739 = vmatpush3.bf16.msra.mxu0 %v10543_v17  ;;  %8859 = vmatprep.mubr.msk.f32.mxu0 %vm10473_vm0, %v10474_v1 }
  0x67   :  { %9740 = vmatprep.subr.bf16.mxu0 %v10472_v0  ;;  %v2057_v15 = vsub.f32 %v10668_v58, %v10821_v50 }
  0x68   :  { %8853 = vmatmul.mubr.f32.vlgmr.msra.gmra.mrb[0].mxu1 %v10601_v59  ;;  %v10828_v59 = vand.u32 4294901760, %v10701_v35 }
  0x69   :  { %9757 = vmatpush3.bf16.msra.mxu1 %v10543_v17  ;;  %8901 = vmatprep.mubr.msk.f32.mxu1 %vm10473_vm0, %v10474_v1  ;;  %v2058_v19 = vand.u32 4294901760, %v2057_v15 }
  0x6a   :  { %8860 = vmatmul.mubr.f32.vlgmr.msra.gmra.mrb[2].mxu0 %v1110_v10  ;;  %9758 = vmatprep.subr.bf16.mxu1 %v10472_v0  ;;  %v2532_v16 = vsub.f32 %v10701_v35, %v10828_v59  ;;  %v10912_v35 = vsub.f32 %v10753_v6, %v10900_v31 }
  0x6b   :  { %9742 = vmatpush3.bf16.msra.mxu0 %v10611_v2  ;;  %8866 = vmatprep.mubr.msk.f32.mxu0 %vm10473_vm0, %v10474_v1  ;;  %v2059_v58 = vsub.f32 %v2057_v15, %v2058_v19 }
  0x6c   :  { %8902 = vmatmul.mubr.f32.vlgmr.msra.gmra.mrb[2].mxu1 %v1585_v14  ;;  %9743 = vmatprep.subr.bf16.mxu0 %v10472_v0  ;;  %v2533_v20 = vand.u32 4294901760, %v2532_v16  ;;  %v3483_v37 = vand.u32 4294901760, %v10912_v35 }
  0x6d   :  { %9760 = vmatpush3.bf16.msra.mxu1 %v10611_v2  ;;  %8908 = vmatprep.mubr.msk.f32.mxu1 %vm10473_vm0, %v10474_v1  ;;  %v2060_v23 = vand.u32 4294901760, %v2059_v58 }
  0x6e   :  { %9761 = vmatprep.subr.bf16.mxu1 %v10472_v0  ;;  %v2534_v22 = vsub.f32 %v2532_v16, %v2533_v20  ;;  %v3484_v39 = vsub.f32 %v10912_v35, %v3483_v37 }
  0x70   :  { %v2535_v26 = vand.u32 4294901760, %v2534_v22  ;;  %v3485_v46 = vand.u32 4294901760, %v3484_v39 }
  0x72   :  { %8867 = vmatmul.mubr.f32.vlgmr.msra.gmra.mrb[2].mxu0 %v10761_v25 }
  0x73   :  { %9745 = vmatpush3.bf16.msra.mxu0 %v10626_v21  ;;  %8873 = vmatprep.mubr.msk.f32.mxu0 %vm10473_vm0, %v10474_v1 }
  0x74   :  { %8909 = vmatmul.mubr.f32.vlgmr.msra.gmra.mrb[2].mxu1 %v10766_v18  ;;  %9746 = vmatprep.subr.bf16.mxu0 %v10472_v0 }
  0x75   :  { %9763 = vmatpush3.bf16.msra.mxu1 %v10626_v21  ;;  %8915 = vmatprep.mubr.msk.f32.mxu1 %vm10473_vm0, %v10474_v1 }
  0x76   :  { %9764 = vmatprep.subr.bf16.mxu1 %v10472_v0 }
  0x7a   :  { %8874 = vmatmul.mubr.f32.vlgmr.msra.gmra.mrb[2].mxu0 %v1107_v33 }
  0x7b   :  { %9748 = vmatpush3.bf16.msra.mxu0 %v10543_v17  ;;  %8880 = vmatprep.mubr.msk.f32.mxu0 %vm10473_vm0, %v10474_v1 }
  0x7c   :  { %8916 = vmatmul.mubr.f32.vlgmr.msra.gmra.mrb[2].mxu1 %v1582_v34  ;;  %9749 = vmatprep.subr.bf16.mxu0 %v10472_v0 }
  0x7d   :  { %9766 = vmatpush3.bf16.msra.mxu1 %v10543_v17  ;;  %8922 = vmatprep.mubr.msk.f32.mxu1 %vm10473_vm0, %v10474_v1 }
  0x7e   :  { %9767 = vmatprep.subr.bf16.mxu1 %v10472_v0 }
  0x82   :  { %8881 = vmatmul.mubr.f32.vlgmr.msra.gmra.mrb[2].mxu0 %v1108_v55 }
  0x83   :  { %9751 = vmatpush3.bf16.msra.mxu0 %v10744_v56  ;;  %8887 = vmatprep.mubr.msk.f32.mxu0 %vm10473_vm0, %v10474_v1 }
  0x84   :  { %8923 = vmatmul.mubr.f32.vlgmr.msra.gmra.mrb[2].mxu1 %v1583_v60  ;;  %9752 = vmatprep.subr.bf16.mxu0 %v10472_v0 }
  0x85   :  { %9769 = vmatpush3.bf16.msra.mxu1 %v10744_v56  ;;  %8929 = vmatprep.mubr.msk.f32.mxu1 %vm10473_vm0, %v10474_v1 }
  0x86   :  { %9770 = vmatprep.subr.bf16.mxu1 %v10472_v0 }
  0x8a   :  { %8888 = vmatmul.mubr.f32.vlgmr.msra.gmra.mrb[2].mxu0 %v10761_v25 }
  0x8b   :  { %9754 = vmatpush3.bf16.msra.mxu0 %v10543_v17  ;;  %8894 = vmatprep.mubr.msk.f32.mxu0 %vm10473_vm0, %v10474_v1 }
  0x8c   :  { %8930 = vmatmul.mubr.f32.vlgmr.msra.gmra.mrb[2].mxu1 %v10766_v18  ;;  %9773 = vmatprep.subr.bf16.mxu0 %v10472_v0 }
  0x8d   :  { %9772 = vmatpush3.bf16.msra.mxu1 %v10543_v17  ;;  %8936 = vmatprep.mubr.msk.f32.mxu1 %vm10473_vm0, %v10474_v1 }
  0x8e   :  { %9791 = vmatprep.subr.bf16.mxu1 %v10472_v0 }
  0x92   :  { %8895 = vmatmul.mubr.f32.vlgmr.msra.gmra.mrb[2].mxu0 %v10761_v25 }
  0x93   :  { %9775 = vmatpush3.bf16.msra.mxu0 %v10543_v17  ;;  %8943 = vmatprep.mubr.msk.f32.mxu0 %vm10473_vm0, %v10474_v1 }
  0x94   :  { %8937 = vmatmul.mubr.f32.vlgmr.msra.gmra.mrb[2].mxu1 %v10766_v18  ;;  %9776 = vmatprep.subr.bf16.mxu0 %v10472_v0 }
  0x95   :  { %9793 = vmatpush3.bf16.msra.mxu1 %v10543_v17  ;;  %8985 = vmatprep.mubr.msk.f32.mxu1 %vm10473_vm0, %v10474_v1 }
  0x96   :  { %8944 = vmatmul.mubr.f32.vlgmr.msra.gmra.mrb[4].mxu0 %v2060_v23  ;;  %9794 = vmatprep.subr.bf16.mxu1 %v10472_v0 }
  0x97   :  { %9778 = vmatpush3.bf16.msra.mxu0 %v10611_v2  ;;  %8950 = vmatprep.mubr.msk.f32.mxu0 %vm10473_vm0, %v10474_v1 }
  0x98   :  { %8986 = vmatmul.mubr.f32.vlgmr.msra.gmra.mrb[4].mxu1 %v2535_v26  ;;  %9779 = vmatprep.subr.bf16.mxu0 %v10472_v0 }
  0x99   :  { %9796 = vmatpush3.bf16.msra.mxu1 %v10611_v2  ;;  %8992 = vmatprep.mubr.msk.f32.mxu1 %vm10473_vm0, %v10474_v1 }
  0x9a   :  { %9797 = vmatprep.subr.bf16.mxu1 %v10472_v0 }
  0x9c   :  { %v10866_v27 = vpop.permute.xlu0 %3878 }
  0x9d   :  { %v3895_v28 = vand.u32 4294901760, %v10866_v27 }
  0x9e   :  { %8951 = vmatmul.mubr.f32.vlgmr.msra.gmra.mrb[4].mxu0 %v10821_v50  ;;  %v10933_v41 = vpop.permute.xlu1 %3882 }
  0x9f   :  { %v10872_v29 = vsub.f32 %v10866_v27, %v3895_v28  ;;  %9781 = vmatpush3.bf16.msra.mxu0 %v10626_v21  ;;  %8957 = vmatprep.mubr.msk.f32.mxu0 %vm10473_vm0, %v10474_v1  ;;  %v3901_v49 = vand.u32 4294901760, %v10933_v41 }
  0xa0   :  { %8993 = vmatmul.mubr.f32.vlgmr.msra.gmra.mrb[4].mxu1 %v10828_v59  ;;  %9782 = vmatprep.subr.bf16.mxu0 %v10472_v0  ;;  %v10935_v42 = vpop.permute.xlu0 %3880 }
  0xa1   :  { %9799 = vmatpush3.bf16.msra.mxu1 %v10626_v21  ;;  %8999 = vmatprep.mubr.msk.f32.mxu1 %vm10473_vm0, %v10474_v1  ;;  %v3976_v40 = vand.u32 4294901760, %v10872_v29  ;;  %v3898_v45 = vand.u32 4294901760, %v10935_v42  ;;  %v3989_v11 = vsub.f32 %v10933_v41, %v3901_v49 }
  0xa2   :  { %9800 = vmatprep.subr.bf16.mxu1 %v10472_v0  ;;  %v10951_v48 = vpop.permute.xlu1 %3884 }
  0xa3   :  { %v3977_v47 = vsub.f32 %v10872_v29, %v3976_v40  ;;  %v3982_v4 = vsub.f32 %v10935_v42, %v3898_v45  ;;  %v3904_v8 = vand.u32 4294901760, %v10951_v48  ;;  %v3990_v12 = vand.u32 4294901760, %v3989_v11 }
  0xa5   :  { %v3983_v7 = vand.u32 4294901760, %v3982_v4  ;;  %v3978_v9 = vand.u32 4294901760, %v3977_v47  ;;  %v10965_v51 = vpack.c.bf16 %v3982_v4, %v10872_v29  ;;  %v3996_v52 = vsub.f32 %v10951_v48, %v3904_v8 }
  0xa6   :  { %8958 = vmatmul.mubr.f32.vlgmr.msra.gmra.mrb[4].mxu0 %v2057_v15  ;;  %v3991_v62 = vsub.f32 %v3989_v11, %v3990_v12 }
  0xa7   :  { %9784 = vmatpush3.bf16.msra.mxu0 %v10543_v17  ;;  %8964 = vmatprep.mubr.msk.f32.mxu0 %vm10473_vm0, %v10474_v1  ;;  %v3984_v44 = vsub.f32 %v3982_v4, %v3983_v7  ;;  %v10969_v54 = vpack.c.bf16 %v3983_v7, %v3976_v40  ;;  %v3997_v13 = vand.u32 4294901760, %v3996_v52  ;;  %v10971_v57 = vpack.c.bf16 %v3996_v52, %v3989_v11 }
  0xa8   :  { %9000 = vmatmul.mubr.f32.vlgmr.msra.gmra.mrb[4].mxu1 %v2532_v16  ;;  %9785 = vmatprep.subr.bf16.mxu0 %v10472_v0  ;;  %v3992_v6 = vand.u32 4294901760, %v3991_v62 }
  0xa9   :  { %9802 = vmatpush3.bf16.msra.mxu1 %v10543_v17  ;;  %9006 = vmatprep.mubr.msk.f32.mxu1 %vm10473_vm0, %v10474_v1  ;;  %v3985_v53 = vand.u32 4294901760, %v3984_v44  ;;  %v10975_v5 = vpack.c.bf16 %v3997_v13, %v3990_v12 }
  0xaa   :  { %9803 = vmatprep.subr.bf16.mxu1 %v10472_v0 }
  0xab   :  { %v10973_v63 = vpack.c.bf16 %v3985_v53, %v3978_v9 }
  0xae   :  { %8965 = vmatmul.mubr.f32.vlgmr.msra.gmra.mrb[4].mxu0 %v2058_v19 }
  0xaf   :  { %9787 = vmatpush3.bf16.msra.mxu0 %v10744_v56  ;;  %8971 = vmatprep.mubr.msk.f32.mxu0 %vm10473_vm0, %v10474_v1 }
  0xb0   :  { %9007 = vmatmul.mubr.f32.vlgmr.msra.gmra.mrb[4].mxu1 %v2533_v20  ;;  %9788 = vmatprep.subr.bf16.mxu0 %v10472_v0 }
  0xb1   :  { %9805 = vmatpush3.bf16.msra.mxu1 %v10744_v56  ;;  %9013 = vmatprep.mubr.msk.f32.mxu1 %vm10473_vm0, %v10474_v1 }
  0xb2   :  { %9806 = vmatprep.subr.bf16.mxu1 %v10472_v0 }
  0xb6   :  { %8972 = vmatmul.mubr.f32.vlgmr.msra.gmra.mrb[4].mxu0 %v10821_v50 }
  0xb7   :  { %9790 = vmatpush3.bf16.msra.mxu0 %v10543_v17  ;;  %8978 = vmatprep.mubr.msk.f32.mxu0 %vm10473_vm0, %v10474_v1 }
  0xb8   :  { %9014 = vmatmul.mubr.f32.vlgmr.msra.gmra.mrb[4].mxu1 %v10828_v59  ;;  %9809 = vmatprep.subr.bf16.mxu0 %v10472_v0 }
  0xb9   :  { %9808 = vmatpush3.bf16.msra.mxu1 %v10543_v17  ;;  %9020 = vmatprep.mubr.msk.f32.mxu1 %vm10473_vm0, %v10474_v1 }
  0xba   :  { %9827 = vmatprep.subr.bf16.mxu1 %v10472_v0 }
  0xbe   :  { %8979 = vmatmul.mubr.f32.vlgmr.msra.gmra.mrb[4].mxu0 %v10821_v50 }
  0xbf   :  { %9811 = vmatpush3.bf16.msra.mxu0 %v10543_v17  ;;  %9027 = vmatprep.mubr.msk.f32.mxu0 %vm10473_vm0, %v10474_v1 }
  0xc0   :  { %9021 = vmatmul.mubr.f32.vlgmr.msra.gmra.mrb[4].mxu1 %v10828_v59  ;;  %9812 = vmatprep.subr.bf16.mxu0 %v10472_v0 }
  0xc1   :  { %9829 = vmatpush3.bf16.msra.mxu1 %v10543_v17  ;;  %9069 = vmatprep.mubr.msk.f32.mxu1 %vm10473_vm0, %v10474_v1 }
  0xc2   :  { %9028 = vmatmul.mubr.f32.vlgmr.msra.gmra.mrb[6].mxu0 %v3010_v43  ;;  %9830 = vmatprep.subr.bf16.mxu1 %v10472_v0 }
  0xc3   :  { %9814 = vmatpush3.bf16.msra.mxu0 %v10611_v2  ;;  %9034 = vmatprep.mubr.msk.f32.mxu0 %vm10473_vm0, %v10474_v1 }
  0xc4   :  { %9070 = vmatmul.mubr.f32.vlgmr.msra.gmra.mrb[6].mxu1 %v3485_v46  ;;  %9815 = vmatprep.subr.bf16.mxu0 %v10472_v0 }
  0xc5   :  { %9832 = vmatpush3.bf16.msra.mxu1 %v10611_v2  ;;  %9076 = vmatprep.mubr.msk.f32.mxu1 %vm10473_vm0, %v10474_v1  ;;  %v3998_v2 = vsub.f32 %v3996_v52, %v3997_v13 }
  0xc6   :  { %9833 = vmatprep.subr.bf16.mxu1 %v10472_v0 }
  0xc7   :  { %v3999_v24 = vand.u32 4294901760, %v3998_v2 }
  0xc9   :  { %v10986_v25 = vpack.c.bf16 %v3999_v24, %v3992_v6 }
  0xca   :  { %9035 = vmatmul.mubr.f32.vlgmr.msra.gmra.mrb[6].mxu0 %v10893_v30 }
  0xcb   :  { %9817 = vmatpush3.bf16.msra.mxu0 %v10626_v21  ;;  %9041 = vmatprep.mubr.msk.f32.mxu0 %vm10473_vm0, %v10474_v1 }
  0xcc   :  { %9077 = vmatmul.mubr.f32.vlgmr.msra.gmra.mrb[6].mxu1 %v10900_v31  ;;  %9818 = vmatprep.subr.bf16.mxu0 %v10472_v0 }
  0xcd   :  { %9835 = vmatpush3.bf16.msra.mxu1 %v10626_v21  ;;  %9083 = vmatprep.mubr.msk.f32.mxu1 %vm10473_vm0, %v10474_v1  ;;  %v11025_v21 = vpack.c.bf16 %v3898_v45, %v3895_v28 }
  0xce   :  { %9836 = vmatprep.subr.bf16.mxu1 %v10472_v0 }
  0xd2   :  { %9042 = vmatmul.mubr.f32.vlgmr.msra.gmra.mrb[6].mxu0 %v10908_v32 }
  0xd3   :  { %9820 = vmatpush3.bf16.msra.mxu0 %v10543_v17  ;;  %9048 = vmatprep.mubr.msk.f32.mxu0 %vm10473_vm0, %v10474_v1 }
  0xd4   :  { %9084 = vmatmul.mubr.f32.vlgmr.msra.gmra.mrb[6].mxu1 %v10912_v35  ;;  %9821 = vmatprep.subr.bf16.mxu0 %v10472_v0 }
  0xd5   :  { %9838 = vmatpush3.bf16.msra.mxu1 %v10543_v17  ;;  %9090 = vmatprep.mubr.msk.f32.mxu1 %vm10473_vm0, %v10474_v1 }
  0xd6   :  { %9839 = vmatprep.subr.bf16.mxu1 %v10472_v0 }
  0xda   :  { %9049 = vmatmul.mubr.f32.vlgmr.msra.gmra.mrb[6].mxu0 %v3008_v36 }
  0xdb   :  { %9823 = vmatpush3.bf16.msra.mxu0 %v10744_v56  ;;  %9055 = vmatprep.mubr.msk.f32.mxu0 %vm10473_vm0, %v10474_v1 }
  0xdc   :  { %9091 = vmatmul.mubr.f32.vlgmr.msra.gmra.mrb[6].mxu1 %v3483_v37  ;;  %9824 = vmatprep.subr.bf16.mxu0 %v10472_v0 }
  0xdd   :  { %9841 = vmatpush3.bf16.msra.mxu1 %v10744_v56  ;;  %9097 = vmatprep.mubr.msk.f32.mxu1 %vm10473_vm0, %v10474_v1  ;;  %v11028_v56 = vpack.c.bf16 %v3904_v8, %v3901_v49 }
  0xde   :  { %9842 = vmatprep.subr.bf16.mxu1 %v10472_v0 }
  0xe2   :  { %9056 = vmatmul.mubr.f32.vlgmr.msra.gmra.mrb[6].mxu0 %v10893_v30 }
  0xe3   :  { %9826 = vmatpush3.bf16.msra.mxu0 %v10543_v17  ;;  %9062 = vmatprep.mubr.msk.f32.mxu0 %vm10473_vm0, %v10474_v1 }
  0xe4   :  { %9098 = vmatmul.mubr.f32.vlgmr.msra.gmra.mrb[6].mxu1 %v10900_v31  ;;  %9899 = vmatprep.subr.bf16.mxu0 %v10472_v0 }
  0xe5   :  { %9844 = vmatpush3.bf16.msra.mxu1 %v10543_v17  ;;  %9104 = vmatprep.mubr.msk.f32.mxu1 %vm10473_vm0, %v10474_v1  ;;  %v11043_v17 = vld [vmem:[#allocation5 + $0x20] ss:$0 sm:$0xff] }
  0xe6   :  { %9845 = vmatprep.subr.bf16.mxu1 %v10472_v0 }
  0xea   :  { %9063 = vmatmul.mubr.f32.vlgmr.msra.gmra.mrb[6].mxu0 %v10893_v30 }
  0xeb   :  { %9901 = vmatpush3.bf16.msra.mxu0 %v11025_v21  ;;  %9214 = vmatprep.mubr.msk.f32.mxu0 %vm10473_vm0, %v10474_v1 }
  0xec   :  { %9105 = vmatmul.mubr.f32.vlgmr.msra.gmra.mrb[6].mxu1 %v10900_v31  ;;  %9902 = vmatprep.subr.bf16.mxu0 %v10472_v0 }
  0xed   :  { %9847 = vmatpush3.bf16.msra.mxu1 %v11025_v21  ;;  %9115 = vmatprep.mubr.msk.f32.mxu1 %vm10473_vm0, %v10474_v1 }
  0xee   :  { %9848 = vmatprep.subr.bf16.mxu1 %v10472_v0 }
  0xef   :  { %9904 = vmatpush3.bf16.msra.mxu0 %v11028_v56 }
  0xf0   :  { %9905 = vmatprep.subr.bf16.mxu0 %v10472_v0 }
  0xf1   :  { %9850 = vmatpush3.bf16.msra.mxu1 %v11028_v56 }
  0xf2   :  { %9851 = vmatprep.subr.bf16.mxu1 %v10472_v0 }
 0x138   :  { %v544_v18 = vpop.f32.mrb[0].mxu0 }
 0x139   :  { %v10169_v33 = vadd.f32 %v11043_v17, %v544_v18  ;;  %v8812_v34 = vpop.f32.mrb[1].mxu0 }
 0x13b   :  { %10372 = vtanh.f32 %v10169_v33 }
 0x145   :  { %v10373_v55 = vpop.eup %10372 }
 0x146   :  { %v3892_v60 = vsel %vm3890_vm9, %v10373_v55, 0 }
 0x147   :  { %v3963_v61 = vand.u32 4294901760, %v3892_v60 }
 0x149   :  { %v3964_v3 = vsub.f32 %v3892_v60, %v3963_v61 }
 0x14b   :  { %v3965_v10 = vand.u32 4294901760, %v3964_v3 }
 0x14d   :  { %v3966_v14 = vsub.f32 %v3964_v3, %v3965_v10 }
 0x14f   :  { %v3967_v50 = vand.u32 4294901760, %v3966_v14 }
 0x151   :  { %9116 = vmatmul.mubr.f32.vlgmr.msra.gmra.mrb[0].mxu1 %v3967_v50 }
 0x152   :  { %9853 = vmatpush3.bf16.msra.mxu1 %v10973_v63  ;;  %9126 = vmatprep.mubr.msk.f32.mxu1 %vm10473_vm0, %v10474_v1 }
 0x153   :  { %9854 = vmatprep.subr.bf16.mxu1 %v10472_v0 }
 0x156   :  { %9856 = vmatpush3.bf16.msra.mxu1 %v10986_v25 }
 0x157   :  { %9857 = vmatprep.subr.bf16.mxu1 %v10472_v0 }
 0x159   :  { %9127 = vmatmul.mubr.f32.vlgmr.msra.gmra.mrb[0].mxu1 %v3963_v61 }
 0x15a   :  { %9859 = vmatpush3.bf16.msra.mxu1 %v10965_v51  ;;  %9137 = vmatprep.mubr.msk.f32.mxu1 %vm10473_vm0, %v10474_v1 }
 0x15b   :  { %9860 = vmatprep.subr.bf16.mxu1 %v10472_v0 }
 0x15e   :  { %9862 = vmatpush3.bf16.msra.mxu1 %v10971_v57 }
 0x15f   :  { %9863 = vmatprep.subr.bf16.mxu1 %v10472_v0 }
 0x161   :  { %9138 = vmatmul.mubr.f32.vlgmr.msra.gmra.mrb[0].mxu1 %v3964_v3 }
 0x162   :  { %9865 = vmatpush3.bf16.msra.mxu1 %v11025_v21  ;;  %9148 = vmatprep.mubr.msk.f32.mxu1 %vm10473_vm0, %v10474_v1 }
 0x163   :  { %9866 = vmatprep.subr.bf16.mxu1 %v10472_v0 }
 0x165   :  { %v1494_v59 = vpop.f32.mrb[2].mxu0 }
 0x166   :  { %9868 = vmatpush3.bf16.msra.mxu1 %v11028_v56  ;;  %v8896_v15 = vpop.f32.mrb[3].mxu0  ;;  %v10171_v32 = vadd.f32 %v11043_v17, %v1494_v59 }
 0x167   :  { %9869 = vmatprep.subr.bf16.mxu1 %v10472_v0 }
 0x169   :  { %9149 = vmatmul.mubr.f32.vlgmr.msra.gmra.mrb[0].mxu1 %v3965_v10 }
 0x16a   :  { %9871 = vmatpush3.bf16.msra.mxu1 %v10969_v54  ;;  %9159 = vmatprep.mubr.msk.f32.mxu1 %vm10473_vm0, %v10474_v1 }
 0x16b   :  { %9872 = vmatprep.subr.bf16.mxu1 %v10472_v0 }
 0x16e   :  { %9874 = vmatpush3.bf16.msra.mxu1 %v10975_v5 }
 0x16f   :  { %9875 = vmatprep.subr.bf16.mxu1 %v10472_v0 }
 0x171   :  { %9160 = vmatmul.mubr.f32.vlgmr.msra.gmra.mrb[0].mxu1 %v3963_v61 }
 0x172   :  { %9877 = vmatpush3.bf16.msra.mxu1 %v11025_v21  ;;  %9170 = vmatprep.mubr.msk.f32.mxu1 %vm10473_vm0, %v10474_v1 }
 0x173   :  { %9878 = vmatprep.subr.bf16.mxu1 %v10472_v0 }
 0x176   :  { %9880 = vmatpush3.bf16.msra.mxu1 %v11028_v56 }
 0x177   :  { %9881 = vmatprep.subr.bf16.mxu1 %v10472_v0 }
 0x179   :  { %9171 = vmatmul.mubr.f32.vlgmr.msra.gmra.mrb[0].mxu1 %v3963_v61 }
 0x17a   :  { %9883 = vmatpush3.bf16.msra.mxu1 %v11025_v21  ;;  %9181 = vmatprep.mubr.msk.f32.mxu1 %vm10473_vm0, %v10474_v1 }
 0x17b   :  { %9884 = vmatprep.subr.bf16.mxu1 %v10472_v0 }
 0x17e   :  { %9886 = vmatpush3.bf16.msra.mxu1 %v11028_v56 }
 0x17f   :  { %9887 = vmatprep.subr.bf16.mxu1 %v10472_v0 }
 0x24c   :  { %v4375_v16 = vpop.f32.mrb[0].mxu1 }
 0x24d   :  { %v10170_v19 = vadd.f32 %v11043_v17, %v4375_v16  ;;  %v9172_v20 = vpop.f32.mrb[1].mxu1 }
 0x24e   :  { %v11273_v20 = vld [vmem:[#allocation5] sm:$0xff] }
 0x24f   :  { %10374 = vtanh.f32 %v10170_v19  ;;  %v11269_v19 = vld [vmem:[#allocation5 + $0x8] sm:$0xff]  ;;  %7321 = vrot.lane.b32.xlu0 %v11273_v20, %s10476_s6 }
 0x250   :  { %7323 = vrot.lane.b32.xlu1 %v11269_v19, %s10476_s6 }
 0x259   :  { %v10375_v58 = vpop.eup %10374 }
 0x25a   :  { %v4382_v22 = vsel %vm3890_vm9, %v10375_v58, 0  ;;  %v11277_v58 = vld [vmem:[#allocation5 + $0x18] sm:$0xff] }
 0x25b   :  { %v4453_v23 = vand.u32 4294901760, %v4382_v22  ;;  %7327 = vrot.lane.b32.xlu1 %v11277_v58, %s10476_s6 }
 0x25d   :  { %v4454_v26 = vsub.f32 %v4382_v22, %v4453_v23  ;;  %v11281_v22 = vld [vmem:[#allocation5 + $0x10] sm:$0xff] }
 0x25e   :  { %7325 = vrot.lane.b32.xlu0 %v11281_v22, %s10476_s6 }
 0x25f   :  { %v4455_v27 = vand.u32 4294901760, %v4454_v26  ;;  %7828 = vrot.lane.b32.xlu1 %v11273_v20, %s10477_s7 }
 0x261   :  { %9215 = vmatmul.mubr.f32.vlgmr.msra.gmra.mrb[8].mxu0 %v4455_v27  ;;  %v4456_v28 = vsub.f32 %v4454_v26, %v4455_v27 }
 0x262   :  { %9907 = vmatpush3.bf16.msra.mxu0 %v10969_v54  ;;  %9225 = vmatprep.mubr.msk.f32.mxu0 %vm10473_vm0, %v10474_v1 }
 0x263   :  { %9908 = vmatprep.subr.bf16.mxu0 %v10472_v0  ;;  %v4457_v29 = vand.u32 4294901760, %v4456_v28  ;;  %7334 = vrot.lane.b32.xlu0 %v11043_v17, %s10475_s1 }
 0x264   :  { %7832 = vrot.lane.b32.xlu1 %v11281_v22, %s10477_s7 }
 0x265   :  { %9182 = vmatmul.mubr.f32.vlgmr.msra.gmra.mrb[8].mxu1 %v4457_v29 }
 0x266   :  { %9889 = vmatpush3.bf16.msra.mxu1 %v10973_v63  ;;  %9910 = vmatpush3.bf16.msra.mxu0 %v10975_v5 }
 0x267   :  { %9890 = vmatprep.subr.bf16.mxu1 %v10472_v0  ;;  %9911 = vmatprep.subr.bf16.mxu0 %v10472_v0 }
 0x268   :  { %9192 = vmatprep.mubr.msk.f32.mxu1 %vm10473_vm0, %v10474_v1  ;;  %7830 = vrot.lane.b32.xlu0 %v11269_v19, %s10477_s7 }
 0x269   :  { %9226 = vmatmul.mubr.f32.vlgmr.msra.gmra.mrb[8].mxu0 %v4453_v23  ;;  %7840 = vrot.lane.b32.xlu1 %v11043_v17, %s10476_s6 }
 0x26a   :  { %9892 = vmatpush3.bf16.msra.mxu1 %v10986_v25  ;;  %9913 = vmatpush3.bf16.msra.mxu0 %v11025_v21 }
 0x26b   :  { %9893 = vmatprep.subr.bf16.mxu1 %v10472_v0  ;;  %9914 = vmatprep.subr.bf16.mxu0 %v10472_v0 }
 0x26c   :  { %9236 = vmatprep.mubr.msk.f32.mxu0 %vm10473_vm0, %v10474_v1  ;;  %7834 = vrot.lane.b32.xlu0 %v11277_v58, %s10477_s7 }
 0x26d   :  { %9193 = vmatmul.mubr.f32.vlgmr.msra.gmra.mrb[8].mxu1 %v4453_v23 }
 0x26e   :  { %9895 = vmatpush3.bf16.msra.mxu1 %v10965_v51  ;;  %9916 = vmatpush3.bf16.msra.mxu0 %v11028_v56 }
 0x26f   :  { %9896 = vmatprep.subr.bf16.mxu1 %v10472_v0  ;;  %9953 = vmatprep.subr.bf16.mxu0 %v10472_v0 }
 0x270   :  { %9203 = vmatprep.mubr.msk.f32.mxu1 %vm10473_vm0, %v10474_v1 }
 0x271   :  { %9237 = vmatmul.mubr.f32.vlgmr.msra.gmra.mrb[8].mxu0 %v4453_v23 }
 0x272   :  { %9898 = vmatpush3.bf16.msra.mxu1 %v10971_v57  ;;  %9955 = vmatpush3.bf16.msra.mxu0 %v11025_v21 }
 0x273   :  { %9917 = vmatprep.subr.bf16.mxu1 %v10472_v0  ;;  %9956 = vmatprep.subr.bf16.mxu0 %v10472_v0 }
 0x274   :  { %9313 = vmatprep.mubr.msk.f32.mxu0 %vm10473_vm0, %v10474_v1 }
 0x275   :  { %9204 = vmatmul.mubr.f32.vlgmr.msra.gmra.mrb[8].mxu1 %v4454_v26 }
 0x276   :  { %9919 = vmatpush3.bf16.msra.mxu1 %v11025_v21  ;;  %9958 = vmatpush3.bf16.msra.mxu0 %v11028_v56 }
 0x277   :  { %9920 = vmatprep.subr.bf16.mxu1 %v10472_v0  ;;  %9247 = vmatprep.mubr.msk.f32.mxu1 %vm10473_vm0, %v10474_v1 }
 0x278   :  { %9959 = vmatprep.subr.bf16.mxu0 %v10472_v0 }
 0x27a   :  { %9922 = vmatpush3.bf16.msra.mxu1 %v11028_v56 }
 0x27b   :  { %9923 = vmatprep.subr.bf16.mxu1 %v10472_v0 }
 0x344   :  { %v4865_v30 = vpop.f32.mrb[8].mxu0 }
 0x345   :  { %v9238_v31 = vpop.f32.mrb[9].mxu0 }
 0x348   :  { %v4630_v35 = vpop.f32.mrb[8].mxu1 }
 0x349   :  { %v10172_v36 = vadd.f32 %v10171_v32, %v4630_v35  ;;  %v9205_v37 = vpop.f32.mrb[9].mxu1 }
 0x34b   :  { %v10173_v38 = vadd.f32 %v10172_v36, %v4865_v30 }
 0x34d   :  { %10376 = vtanh.f32 %v10173_v38 }
 0x357   :  { %v10377_v39 = vpop.eup %10376 }
 0x358   :  { %v4872_v40 = vsel %vm3890_vm9, %v10377_v39, 0 }
 0x359   :  { %v4943_v41 = vand.u32 4294901760, %v4872_v40 }
 0x35b   :  { %v4944_v42 = vsub.f32 %v4872_v40, %v4943_v41 }
 0x35d   :  { %v4945_v43 = vand.u32 4294901760, %v4944_v42 }
 0x35f   :  { %v4946_v45 = vsub.f32 %v4944_v42, %v4945_v43 }
 0x361   :  { %v4947_v46 = vand.u32 4294901760, %v4946_v45 }
 0x363   :  { %9248 = vmatmul.mubr.f32.vlgmr.msra.gmra.mrb[2].mxu1 %v4947_v46 }
 0x364   :  { %9925 = vmatpush3.bf16.msra.mxu1 %v10973_v63  ;;  %9258 = vmatprep.mubr.msk.f32.mxu1 %vm10473_vm0, %v10474_v1 }
 0x365   :  { %9926 = vmatprep.subr.bf16.mxu1 %v10472_v0 }
 0x368   :  { %9928 = vmatpush3.bf16.msra.mxu1 %v10986_v25 }
 0x369   :  { %9929 = vmatprep.subr.bf16.mxu1 %v10472_v0 }
 0x36b   :  { %9259 = vmatmul.mubr.f32.vlgmr.msra.gmra.mrb[2].mxu1 %v4943_v41 }
 0x36c   :  { %9931 = vmatpush3.bf16.msra.mxu1 %v10965_v51  ;;  %9269 = vmatprep.mubr.msk.f32.mxu1 %vm10473_vm0, %v10474_v1 }
 0x36d   :  { %9932 = vmatprep.subr.bf16.mxu1 %v10472_v0 }
 0x370   :  { %9934 = vmatpush3.bf16.msra.mxu1 %v10971_v57 }
 0x371   :  { %9935 = vmatprep.subr.bf16.mxu1 %v10472_v0 }
 0x373   :  { %9270 = vmatmul.mubr.f32.vlgmr.msra.gmra.mrb[2].mxu1 %v4944_v42 }
 0x374   :  { %9937 = vmatpush3.bf16.msra.mxu1 %v11025_v21  ;;  %9280 = vmatprep.mubr.msk.f32.mxu1 %vm10473_vm0, %v10474_v1 }
 0x375   :  { %9938 = vmatprep.subr.bf16.mxu1 %v10472_v0 }
 0x378   :  { %9940 = vmatpush3.bf16.msra.mxu1 %v11028_v56 }
 0x379   :  { %9941 = vmatprep.subr.bf16.mxu1 %v10472_v0 }
 0x37b   :  { %9281 = vmatmul.mubr.f32.vlgmr.msra.gmra.mrb[2].mxu1 %v4945_v43 }
 0x37c   :  { %9943 = vmatpush3.bf16.msra.mxu1 %v10969_v54  ;;  %9291 = vmatprep.mubr.msk.f32.mxu1 %vm10473_vm0, %v10474_v1 }
 0x37d   :  { %9944 = vmatprep.subr.bf16.mxu1 %v10472_v0 }
 0x380   :  { %9946 = vmatpush3.bf16.msra.mxu1 %v10975_v5 }
 0x381   :  { %9947 = vmatprep.subr.bf16.mxu1 %v10472_v0 }
 0x383   :  { %9292 = vmatmul.mubr.f32.vlgmr.msra.gmra.mrb[2].mxu1 %v4943_v41 }
 0x384   :  { %9949 = vmatpush3.bf16.msra.mxu1 %v11025_v21  ;;  %9302 = vmatprep.mubr.msk.f32.mxu1 %vm10473_vm0, %v10474_v1 }
 0x385   :  { %9950 = vmatprep.subr.bf16.mxu1 %v10472_v0 }
 0x388   :  { %9952 = vmatpush3.bf16.msra.mxu1 %v11028_v56 }
 0x389   :  { %9989 = vmatprep.subr.bf16.mxu1 %v10472_v0 }
 0x38b   :  { %9303 = vmatmul.mubr.f32.vlgmr.msra.gmra.mrb[2].mxu1 %v4943_v41 }
 0x38c   :  { %9991 = vmatpush3.bf16.msra.mxu1 %v11025_v21  ;;  %9379 = vmatprep.mubr.msk.f32.mxu1 %vm10473_vm0, %v10474_v1 }
 0x38d   :  { %9992 = vmatprep.subr.bf16.mxu1 %v10472_v0 }
 0x390   :  { %9994 = vmatpush3.bf16.msra.mxu1 %v11028_v56 }
 0x391   :  { %9995 = vmatprep.subr.bf16.mxu1 %v10472_v0 }
 0x45e   :  { %v5355_v47 = vpop.f32.mrb[2].mxu1 }
 0x45f   :  { %v10174_v4 = vadd.f32 %v11043_v17, %v5355_v47  ;;  %v9304_v48 = vpop.f32.mrb[3].mxu1 }
 0x461   :  { %10378 = vtanh.f32 %v10174_v4 }
 0x46b   :  { %v10379_v49 = vpop.eup %10378 }
 0x46c   :  { %v5362_v7 = vsel %vm3890_vm9, %v10379_v49, 0 }
 0x46d   :  { %v5433_v8 = vand.u32 4294901760, %v5362_v7 }
 0x46f   :  { %v5434_v9 = vsub.f32 %v5362_v7, %v5433_v8 }
 0x471   :  { %v5435_v11 = vand.u32 4294901760, %v5434_v9 }
 0x473   :  { %v5436_v44 = vsub.f32 %v5434_v9, %v5435_v11 }
 0x475   :  { %v5437_v52 = vand.u32 4294901760, %v5436_v44 }
 0x477   :  { %9314 = vmatmul.mubr.f32.vlgmr.msra.gmra.mrb[4].mxu0 %v5437_v52 }
 0x478   :  { %9961 = vmatpush3.bf16.msra.mxu0 %v10973_v63  ;;  %9324 = vmatprep.mubr.msk.f32.mxu0 %vm10473_vm0, %v10474_v1 }
 0x479   :  { %9962 = vmatprep.subr.bf16.mxu0 %v10472_v0 }
 0x47c   :  { %9964 = vmatpush3.bf16.msra.mxu0 %v10986_v25 }
 0x47d   :  { %9965 = vmatprep.subr.bf16.mxu0 %v10472_v0 }
 0x47f   :  { %9325 = vmatmul.mubr.f32.vlgmr.msra.gmra.mrb[4].mxu0 %v5433_v8 }
 0x480   :  { %9967 = vmatpush3.bf16.msra.mxu0 %v10965_v51  ;;  %9335 = vmatprep.mubr.msk.f32.mxu0 %vm10473_vm0, %v10474_v1 }
 0x481   :  { %9968 = vmatprep.subr.bf16.mxu0 %v10472_v0 }
 0x484   :  { %9970 = vmatpush3.bf16.msra.mxu0 %v10971_v57 }
 0x485   :  { %9971 = vmatprep.subr.bf16.mxu0 %v10472_v0 }
 0x487   :  { %9336 = vmatmul.mubr.f32.vlgmr.msra.gmra.mrb[4].mxu0 %v5434_v9 }
 0x488   :  { %9973 = vmatpush3.bf16.msra.mxu0 %v11025_v21  ;;  %9346 = vmatprep.mubr.msk.f32.mxu0 %vm10473_vm0, %v10474_v1 }
 0x489   :  { %9974 = vmatprep.subr.bf16.mxu0 %v10472_v0 }
 0x48c   :  { %9976 = vmatpush3.bf16.msra.mxu0 %v11028_v56 }
 0x48d   :  { %9977 = vmatprep.subr.bf16.mxu0 %v10472_v0 }
 0x48f   :  { %9347 = vmatmul.mubr.f32.vlgmr.msra.gmra.mrb[4].mxu0 %v5435_v11 }
 0x490   :  { %9979 = vmatpush3.bf16.msra.mxu0 %v10969_v54  ;;  %9357 = vmatprep.mubr.msk.f32.mxu0 %vm10473_vm0, %v10474_v1 }
 0x491   :  { %9980 = vmatprep.subr.bf16.mxu0 %v10472_v0 }
 0x494   :  { %9982 = vmatpush3.bf16.msra.mxu0 %v10975_v5 }
 0x495   :  { %9983 = vmatprep.subr.bf16.mxu0 %v10472_v0 }
 0x497   :  { %9358 = vmatmul.mubr.f32.vlgmr.msra.gmra.mrb[4].mxu0 %v5433_v8 }
 0x498   :  { %9985 = vmatpush3.bf16.msra.mxu0 %v11025_v21  ;;  %9368 = vmatprep.mubr.msk.f32.mxu0 %vm10473_vm0, %v10474_v1 }
 0x499   :  { %9986 = vmatprep.subr.bf16.mxu0 %v10472_v0 }
 0x49c   :  { %9988 = vmatpush3.bf16.msra.mxu0 %v11028_v56 }
 0x49d   :  { %10025 = vmatprep.subr.bf16.mxu0 %v10472_v0 }
 0x49f   :  { %9369 = vmatmul.mubr.f32.vlgmr.msra.gmra.mrb[4].mxu0 %v5433_v8 }
 0x4a0   :  { %10027 = vmatpush3.bf16.msra.mxu0 %v11025_v21  ;;  %9445 = vmatprep.mubr.msk.f32.mxu0 %vm10473_vm0, %v10474_v1 }
 0x4a1   :  { %10028 = vmatprep.subr.bf16.mxu0 %v10472_v0 }
 0x4a4   :  { %10030 = vmatpush3.bf16.msra.mxu0 %v11028_v56 }
 0x4a5   :  { %10031 = vmatprep.subr.bf16.mxu0 %v10472_v0 }
 0x572   :  { %v5845_v12 = vpop.f32.mrb[4].mxu0 }
 0x573   :  { %v10175_v53 = vadd.f32 %v11043_v17, %v5845_v12  ;;  %v9370_v13 = vpop.f32.mrb[5].mxu0 }
 0x575   :  { %10380 = vtanh.f32 %v10175_v53 }
 0x57f   :  { %v10381_v62 = vpop.eup %10380 }
 0x580   :  { %v5852_v2 = vsel %vm3890_vm9, %v10381_v62, 0 }
 0x581   :  { %v5923_v6 = vand.u32 4294901760, %v5852_v2 }
 0x583   :  { %v5924_v24 = vsub.f32 %v5852_v2, %v5923_v6 }
 0x585   :  { %v5925_v18 = vand.u32 4294901760, %v5924_v24 }
 0x587   :  { %v5926_v33 = vsub.f32 %v5924_v24, %v5925_v18 }
 0x589   :  { %v5927_v34 = vand.u32 4294901760, %v5926_v33 }
 0x58b   :  { %9380 = vmatmul.mubr.f32.vlgmr.msra.gmra.mrb[4].mxu1 %v5927_v34 }
 0x58c   :  { %9997 = vmatpush3.bf16.msra.mxu1 %v10973_v63  ;;  %9390 = vmatprep.mubr.msk.f32.mxu1 %vm10473_vm0, %v10474_v1 }
 0x58d   :  { %9998 = vmatprep.subr.bf16.mxu1 %v10472_v0 }
 0x590   :  { %10000 = vmatpush3.bf16.msra.mxu1 %v10986_v25 }
 0x591   :  { %10001 = vmatprep.subr.bf16.mxu1 %v10472_v0 }
 0x593   :  { %9391 = vmatmul.mubr.f32.vlgmr.msra.gmra.mrb[4].mxu1 %v5923_v6 }
 0x594   :  { %10003 = vmatpush3.bf16.msra.mxu1 %v10965_v51  ;;  %9401 = vmatprep.mubr.msk.f32.mxu1 %vm10473_vm0, %v10474_v1 }
 0x595   :  { %10004 = vmatprep.subr.bf16.mxu1 %v10472_v0 }
 0x598   :  { %10006 = vmatpush3.bf16.msra.mxu1 %v10971_v57 }
 0x599   :  { %10007 = vmatprep.subr.bf16.mxu1 %v10472_v0 }
 0x59b   :  { %9402 = vmatmul.mubr.f32.vlgmr.msra.gmra.mrb[4].mxu1 %v5924_v24 }
 0x59c   :  { %10009 = vmatpush3.bf16.msra.mxu1 %v11025_v21  ;;  %9412 = vmatprep.mubr.msk.f32.mxu1 %vm10473_vm0, %v10474_v1 }
 0x59d   :  { %10010 = vmatprep.subr.bf16.mxu1 %v10472_v0 }
 0x5a0   :  { %10012 = vmatpush3.bf16.msra.mxu1 %v11028_v56 }
 0x5a1   :  { %10013 = vmatprep.subr.bf16.mxu1 %v10472_v0 }
 0x5a3   :  { %9413 = vmatmul.mubr.f32.vlgmr.msra.gmra.mrb[4].mxu1 %v5925_v18 }
 0x5a4   :  { %10015 = vmatpush3.bf16.msra.mxu1 %v10969_v54  ;;  %9423 = vmatprep.mubr.msk.f32.mxu1 %vm10473_vm0, %v10474_v1 }
 0x5a5   :  { %10016 = vmatprep.subr.bf16.mxu1 %v10472_v0 }
 0x5a8   :  { %10018 = vmatpush3.bf16.msra.mxu1 %v10975_v5 }
 0x5a9   :  { %10019 = vmatprep.subr.bf16.mxu1 %v10472_v0 }
 0x5ab   :  { %9424 = vmatmul.mubr.f32.vlgmr.msra.gmra.mrb[4].mxu1 %v5923_v6 }
 0x5ac   :  { %10021 = vmatpush3.bf16.msra.mxu1 %v11025_v21  ;;  %9434 = vmatprep.mubr.msk.f32.mxu1 %vm10473_vm0, %v10474_v1 }
 0x5ad   :  { %10022 = vmatprep.subr.bf16.mxu1 %v10472_v0 }
 0x5b0   :  { %10024 = vmatpush3.bf16.msra.mxu1 %v11028_v56 }
 0x5b1   :  { %10061 = vmatprep.subr.bf16.mxu1 %v10472_v0 }
 0x5b3   :  { %9435 = vmatmul.mubr.f32.vlgmr.msra.gmra.mrb[4].mxu1 %v5923_v6 }
 0x5b4   :  { %10063 = vmatpush3.bf16.msra.mxu1 %v11025_v21  ;;  %9511 = vmatprep.mubr.msk.f32.mxu1 %vm10473_vm0, %v10474_v1 }
 0x5b5   :  { %10064 = vmatprep.subr.bf16.mxu1 %v10472_v0 }
 0x5b8   :  { %10066 = vmatpush3.bf16.msra.mxu1 %v11028_v56 }
 0x5b9   :  { %10067 = vmatprep.subr.bf16.mxu1 %v10472_v0 }
 0x686   :  { %v6335_v55 = vpop.f32.mrb[4].mxu1 }
 0x687   :  { %v10176_v60 = vadd.f32 %v11043_v17, %v6335_v55  ;;  %v9436_v61 = vpop.f32.mrb[5].mxu1 }
 0x689   :  { %10382 = vtanh.f32 %v10176_v60 }
 0x693   :  { %v10383_v3 = vpop.eup %10382 }
 0x694   :  { %v6342_v10 = vsel %vm3890_vm9, %v10383_v3, 0 }
 0x695   :  { %v6413_v14 = vand.u32 4294901760, %v6342_v10 }
 0x697   :  { %v6414_v50 = vsub.f32 %v6342_v10, %v6413_v14 }
 0x699   :  { %v6415_v59 = vand.u32 4294901760, %v6414_v50 }
 0x69b   :  { %v6416_v15 = vsub.f32 %v6414_v50, %v6415_v59 }
 0x69d   :  { %v6417_v16 = vand.u32 4294901760, %v6416_v15 }
 0x69f   :  { %9446 = vmatmul.mubr.f32.vlgmr.msra.gmra.mrb[6].mxu0 %v6417_v16 }
 0x6a0   :  { %10033 = vmatpush3.bf16.msra.mxu0 %v10973_v63  ;;  %9456 = vmatprep.mubr.msk.f32.mxu0 %vm10473_vm0, %v10474_v1 }
 0x6a1   :  { %10034 = vmatprep.subr.bf16.mxu0 %v10472_v0 }
 0x6a4   :  { %10036 = vmatpush3.bf16.msra.mxu0 %v10986_v25 }
 0x6a5   :  { %10037 = vmatprep.subr.bf16.mxu0 %v10472_v0 }
 0x6a7   :  { %9457 = vmatmul.mubr.f32.vlgmr.msra.gmra.mrb[6].mxu0 %v6413_v14 }
 0x6a8   :  { %10039 = vmatpush3.bf16.msra.mxu0 %v10965_v51  ;;  %9467 = vmatprep.mubr.msk.f32.mxu0 %vm10473_vm0, %v10474_v1 }
 0x6a9   :  { %10040 = vmatprep.subr.bf16.mxu0 %v10472_v0 }
 0x6ac   :  { %10042 = vmatpush3.bf16.msra.mxu0 %v10971_v57 }
 0x6ad   :  { %10043 = vmatprep.subr.bf16.mxu0 %v10472_v0 }
 0x6af   :  { %9468 = vmatmul.mubr.f32.vlgmr.msra.gmra.mrb[6].mxu0 %v6414_v50 }
 0x6b0   :  { %10045 = vmatpush3.bf16.msra.mxu0 %v11025_v21  ;;  %9478 = vmatprep.mubr.msk.f32.mxu0 %vm10473_vm0, %v10474_v1 }
 0x6b1   :  { %10046 = vmatprep.subr.bf16.mxu0 %v10472_v0 }
 0x6b4   :  { %10048 = vmatpush3.bf16.msra.mxu0 %v11028_v56 }
 0x6b5   :  { %10049 = vmatprep.subr.bf16.mxu0 %v10472_v0 }
 0x6b7   :  { %9479 = vmatmul.mubr.f32.vlgmr.msra.gmra.mrb[6].mxu0 %v6415_v59 }
 0x6b8   :  { %10051 = vmatpush3.bf16.msra.mxu0 %v10969_v54  ;;  %9489 = vmatprep.mubr.msk.f32.mxu0 %vm10473_vm0, %v10474_v1 }
 0x6b9   :  { %10052 = vmatprep.subr.bf16.mxu0 %v10472_v0 }
 0x6bc   :  { %10054 = vmatpush3.bf16.msra.mxu0 %v10975_v5 }
 0x6bd   :  { %10055 = vmatprep.subr.bf16.mxu0 %v10472_v0 }
 0x6bf   :  { %9490 = vmatmul.mubr.f32.vlgmr.msra.gmra.mrb[6].mxu0 %v6413_v14 }
 0x6c0   :  { %10057 = vmatpush3.bf16.msra.mxu0 %v11025_v21  ;;  %9500 = vmatprep.mubr.msk.f32.mxu0 %vm10473_vm0, %v10474_v1 }
 0x6c1   :  { %10058 = vmatprep.subr.bf16.mxu0 %v10472_v0 }
 0x6c4   :  { %10060 = vmatpush3.bf16.msra.mxu0 %v11028_v56 }
 0x6c5   :  { %10097 = vmatprep.subr.bf16.mxu0 %v10472_v0 }
 0x6c7   :  { %9501 = vmatmul.mubr.f32.vlgmr.msra.gmra.mrb[6].mxu0 %v6413_v14 }
 0x6c8   :  { %9577 = vmatprep.mubr.msk.f32.mxu0 %vm10473_vm0, %v10474_v1 }
 0x79a   :  { %v6825_v23 = vpop.f32.mrb[6].mxu0 }
 0x79b   :  { %v10177_v26 = vadd.f32 %v11043_v17, %v6825_v23  ;;  %v9502_v27 = vpop.f32.mrb[7].mxu0 }
 0x79d   :  { %10384 = vtanh.f32 %v10177_v26 }
 0x7a7   :  { %v10385_v28 = vpop.eup %10384 }
 0x7a8   :  { %v6832_v29 = vsel %vm3890_vm9, %v10385_v28, 0 }
 0x7a9   :  { %v6903_v30 = vand.u32 4294901760, %v6832_v29 }
 0x7ab   :  { %v6904_v31 = vsub.f32 %v6832_v29, %v6903_v30 }
 0x7ad   :  { %v6905_v32 = vand.u32 4294901760, %v6904_v31 }
 0x7af   :  { %v6906_v35 = vsub.f32 %v6904_v31, %v6905_v32 }
 0x7b1   :  { %v6907_v36 = vand.u32 4294901760, %v6906_v35 }
 0x7b3   :  { %9512 = vmatmul.mubr.f32.vlgmr.msra.gmra.mrb[6].mxu1 %v6907_v36 }
 0x7b4   :  { %10069 = vmatpush3.bf16.msra.mxu1 %v10973_v63  ;;  %9522 = vmatprep.mubr.msk.f32.mxu1 %vm10473_vm0, %v10474_v1 }
 0x7b5   :  { %10070 = vmatprep.subr.bf16.mxu1 %v10472_v0 }
 0x7b8   :  { %10072 = vmatpush3.bf16.msra.mxu1 %v10986_v25 }
 0x7b9   :  { %10073 = vmatprep.subr.bf16.mxu1 %v10472_v0 }
 0x7bb   :  { %9523 = vmatmul.mubr.f32.vlgmr.msra.gmra.mrb[6].mxu1 %v6903_v30 }
 0x7bc   :  { %10075 = vmatpush3.bf16.msra.mxu1 %v10965_v51  ;;  %9533 = vmatprep.mubr.msk.f32.mxu1 %vm10473_vm0, %v10474_v1  ;;  %v7324_v51 = vpop.permute.xlu1 %7323 }
 0x7bd   :  { %10076 = vmatprep.subr.bf16.mxu1 %v10472_v0 }
 0x7c0   :  { %10078 = vmatpush3.bf16.msra.mxu1 %v10971_v57  ;;  %v7344_v57 = vand.u32 4294901760, %v7324_v51 }
 0x7c1   :  { %10079 = vmatprep.subr.bf16.mxu1 %v10472_v0 }
 0x7c2   :  { %v7428_v25 = vsub.f32 %v7324_v51, %v7344_v57 }
 0x7c3   :  { %9534 = vmatmul.mubr.f32.vlgmr.msra.gmra.mrb[6].mxu1 %v6904_v31 }
 0x7c4   :  { %10081 = vmatpush3.bf16.msra.mxu1 %v11025_v21  ;;  %9544 = vmatprep.mubr.msk.f32.mxu1 %vm10473_vm0, %v10474_v1  ;;  %v7429_v39 = vand.u32 4294901760, %v7428_v25 }
 0x7c5   :  { %10082 = vmatprep.subr.bf16.mxu1 %v10472_v0 }
 0x7c6   :  { %v7430_v45 = vsub.f32 %v7428_v25, %v7429_v39 }
 0x7c8   :  { %10084 = vmatpush3.bf16.msra.mxu1 %v11028_v56  ;;  %v7431_v48 = vand.u32 4294901760, %v7430_v45 }
 0x7c9   :  { %10085 = vmatprep.subr.bf16.mxu1 %v10472_v0 }
 0x7cb   :  { %9545 = vmatmul.mubr.f32.vlgmr.msra.gmra.mrb[6].mxu1 %v6905_v32 }
 0x7cc   :  { %10087 = vmatpush3.bf16.msra.mxu1 %v10969_v54  ;;  %9555 = vmatprep.mubr.msk.f32.mxu1 %vm10473_vm0, %v10474_v1  ;;  %v7322_v54 = vpop.permute.xlu0 %7321 }
 0x7cd   :  { %10088 = vmatprep.subr.bf16.mxu1 %v10472_v0  ;;  %v7341_v63 = vand.u32 4294901760, %v7322_v54 }
 0x7cf   :  { %v7421_v37 = vsub.f32 %v7322_v54, %v7341_v63  ;;  %v11318_v40 = vpack.c.bf16 %v7344_v57, %v7341_v63 }
 0x7d0   :  { %10090 = vmatpush3.bf16.msra.mxu1 %v10975_v5  ;;  %v7328_v5 = vpop.permute.xlu1 %7327  ;;  %v7326_v38 = vpop.permute.xlu0 %7325 }
 0x7d1   :  { %10091 = vmatprep.subr.bf16.mxu1 %v10472_v0  ;;  %v10110_v41 = vpack.c.bf16 %v7428_v25, %v7421_v37  ;;  %v7350_v42 = vand.u32 4294901760, %v7328_v5  ;;  %v7347_v43 = vand.u32 4294901760, %v7326_v38  ;;  %10099 = vmatpush3.bf16.msra.mxu0 %v11318_v40 }
 0x7d2   :  { %10100 = vmatprep.subr.bf16.mxu0 %v10472_v0 }
 0x7d3   :  { %9556 = vmatmul.mubr.f32.vlgmr.msra.gmra.mrb[6].mxu1 %v6903_v30  ;;  %v11321_v47 = vpack.c.bf16 %v7350_v42, %v7347_v43  ;;  %v7435_v4 = vsub.f32 %v7326_v38, %v7347_v43 }
 0x7d4   :  { %10093 = vmatpush3.bf16.msra.mxu1 %v11025_v21  ;;  %9566 = vmatprep.mubr.msk.f32.mxu1 %vm10473_vm0, %v10474_v1  ;;  %v7422_v21 = vand.u32 4294901760, %v7421_v37  ;;  %v7829_v14 = vpop.permute.xlu1 %7828 }
 0x7d5   :  { %10094 = vmatprep.subr.bf16.mxu1 %v10472_v0  ;;  %v7436_v9 = vand.u32 4294901760, %v7435_v4  ;;  %10102 = vmatpush3.bf16.msra.mxu0 %v11321_v47  ;;  %v7847_v59 = vand.u32 4294901760, %v7829_v14 }
 0x7d6   :  { %v7423_v46 = vsub.f32 %v7421_v37, %v7422_v21  ;;  %v10122_v7 = vpack.c.bf16 %v7429_v39, %v7422_v21  ;;  %10103 = vmatprep.subr.bf16.mxu0 %v10472_v0 }
 0x7d7   :  { %v7437_v12 = vsub.f32 %v7435_v4, %v7436_v9  ;;  %v7927_v16 = vsub.f32 %v7829_v14, %v7847_v59 }
 0x7d8   :  { %10096 = vmatpush3.bf16.msra.mxu1 %v11028_v56  ;;  %v7442_v56 = vsub.f32 %v7328_v5, %v7350_v42  ;;  %v7424_v49 = vand.u32 4294901760, %v7423_v46  ;;  %v7833_v28 = vpop.permute.xlu1 %7832 }
 0x7d9   :  { %v7438_v62 = vand.u32 4294901760, %v7437_v12  ;;  %v7928_v22 = vand.u32 4294901760, %v7927_v16 }
 0x7da   :  { %v7443_v8 = vand.u32 4294901760, %v7442_v56  ;;  %v10113_v11 = vpack.c.bf16 %v7442_v56, %v7435_v4  ;;  %v10104_v44 = vpack.c.bf16 %v7431_v48, %v7424_v49 }
 0x7db   :  { %9567 = vmatmul.mubr.f32.vlgmr.msra.gmra.mrb[6].mxu1 %v6903_v30  ;;  %v7929_v26 = vsub.f32 %v7927_v16, %v7928_v22  ;;  %v7853_v30 = vand.u32 4294901760, %v7833_v28 }
 0x7dc   :  { %v7444_v52 = vsub.f32 %v7442_v56, %v7443_v8  ;;  %v10125_v53 = vpack.c.bf16 %v7443_v8, %v7436_v9 }
 0x7dd   :  { %v7930_v32 = vand.u32 4294901760, %v7929_v26  ;;  %v7941_v36 = vsub.f32 %v7833_v28, %v7853_v30 }
 0x7de   :  { %v7445_v13 = vand.u32 4294901760, %v7444_v52 }
 0x7df   :  { %v7942_v57 = vand.u32 4294901760, %v7941_v36 }
 0x7e0   :  { %v10107_v2 = vpack.c.bf16 %v7445_v13, %v7438_v62 }
 0x7e1   :  { %v7943_v5 = vsub.f32 %v7941_v36, %v7942_v57 }
 0x7e3   :  { %v7944_v21 = vand.u32 4294901760, %v7943_v5 }
 0x8ae   :  { %v7315_v6 = vpop.f32.mrb[6].mxu1 }
 0x8af   :  { %v10178_v24 = vadd.f32 %v11043_v17, %v7315_v6  ;;  %v9568_v18 = vpop.f32.mrb[7].mxu1  ;;  %v7335_v17 = vpop.permute.xlu0 %7334 }
 0x8b1   :  { %10386 = vtanh.f32 %v10178_v24 }
 0x8b3   :  { %v7831_v50 = vpop.permute.xlu0 %7830 }
 0x8b4   :  { %v7850_v15 = vand.u32 4294901760, %v7831_v50 }
 0x8b6   :  { %v7934_v19 = vsub.f32 %v7831_v50, %v7850_v15  ;;  %v11357_v58 = vpack.c.bf16 %v7850_v15, %v7847_v59 }
 0x8b7   :  { %v7835_v29 = vpop.permute.xlu0 %7834 }
 0x8b8   :  { %v10146_v20 = vpack.c.bf16 %v7934_v19, %v7927_v16  ;;  %v7935_v23 = vand.u32 4294901760, %v7934_v19  ;;  %v7856_v31 = vand.u32 4294901760, %v7835_v29 }
 0x8ba   :  { %v7936_v27 = vsub.f32 %v7934_v19, %v7935_v23  ;;  %v10137_v51 = vpack.c.bf16 %v7856_v31, %v7853_v30  ;;  %v7948_v54 = vsub.f32 %v7835_v29, %v7856_v31  ;;  %v10158_v37 = vpack.c.bf16 %v7935_v23, %v7928_v22 }
 0x8bb   :  { %v10387_v33 = vpop.eup %10386 }
 0x8bc   :  { %v7338_v34 = vsel %vm3890_vm9, %v10387_v33, 0  ;;  %v7937_v35 = vand.u32 4294901760, %v7936_v27  ;;  %v7949_v63 = vand.u32 4294901760, %v7948_v54  ;;  %v10149_v25 = vpack.c.bf16 %v7948_v54, %v7941_v36 }
 0x8bd   :  { %v7409_v55 = vand.u32 4294901760, %v7338_v34 }
 0x8be   :  { %v7950_v38 = vsub.f32 %v7948_v54, %v7949_v63  ;;  %v10161_v39 = vpack.c.bf16 %v7949_v63, %v7942_v57 }
 0x8bf   :  { %v7410_v60 = vsub.f32 %v7338_v34, %v7409_v55 }
 0x8c1   :  { %v7411_v61 = vand.u32 4294901760, %v7410_v60 }
 0x8c3   :  { %v7412_v3 = vsub.f32 %v7410_v60, %v7411_v61 }
 0x8c5   :  { %v7413_v10 = vand.u32 4294901760, %v7412_v3 }
 0x8c7   :  { %9578 = vmatmul.mubr.f32.vlgmr.msra.gmra.mrb[10].mxu0 %v7413_v10 }
 0x8c8   :  { %10105 = vmatpush3.bf16.msra.mxu0 %v10104_v44  ;;  %9588 = vmatprep.mubr.msk.f32.mxu0 %vm10473_vm0, %v10474_v1 }
 0x8c9   :  { %10106 = vmatprep.subr.bf16.mxu0 %v10472_v0 }
 0x8cc   :  { %10108 = vmatpush3.bf16.msra.mxu0 %v10107_v2 }
 0x8cd   :  { %10109 = vmatprep.subr.bf16.mxu0 %v10472_v0 }
 0x8cf   :  { %9589 = vmatmul.mubr.f32.vlgmr.msra.gmra.mrb[10].mxu0 %v7409_v55 }
 0x8d0   :  { %10111 = vmatpush3.bf16.msra.mxu0 %v10110_v41  ;;  %9599 = vmatprep.mubr.msk.f32.mxu0 %vm10473_vm0, %v10474_v1  ;;  %v7951_v41 = vand.u32 4294901760, %v7950_v38 }
 0x8d1   :  { %10112 = vmatprep.subr.bf16.mxu0 %v10472_v0 }
 0x8d2   :  { %v10143_v42 = vpack.c.bf16 %v7951_v41, %v7944_v21 }
 0x8d4   :  { %10114 = vmatpush3.bf16.msra.mxu0 %v10113_v11  ;;  %v7841_v11 = vpop.permute.xlu1 %7840 }
 0x8d5   :  { %10115 = vmatprep.subr.bf16.mxu0 %v10472_v0 }
 0x8d7   :  { %9600 = vmatmul.mubr.f32.vlgmr.msra.gmra.mrb[10].mxu0 %v7410_v60 }
 0x8d8   :  { %10117 = vmatpush3.bf16.msra.mxu0 %v11318_v40  ;;  %9610 = vmatprep.mubr.msk.f32.mxu0 %vm10473_vm0, %v10474_v1 }
 0x8d9   :  { %10118 = vmatprep.subr.bf16.mxu0 %v10472_v0 }
 0x8dc   :  { %10120 = vmatpush3.bf16.msra.mxu0 %v11321_v47 }
 0x8dd   :  { %10121 = vmatprep.subr.bf16.mxu0 %v10472_v0 }
 0x8df   :  { %9611 = vmatmul.mubr.f32.vlgmr.msra.gmra.mrb[10].mxu0 %v7411_v61 }
 0x8e0   :  { %10123 = vmatpush3.bf16.msra.mxu0 %v10122_v7  ;;  %9621 = vmatprep.mubr.msk.f32.mxu0 %vm10473_vm0, %v10474_v1 }
 0x8e1   :  { %10124 = vmatprep.subr.bf16.mxu0 %v10472_v0 }
 0x8e4   :  { %10126 = vmatpush3.bf16.msra.mxu0 %v10125_v53 }
 0x8e5   :  { %10127 = vmatprep.subr.bf16.mxu0 %v10472_v0 }
 0x8e7   :  { %9622 = vmatmul.mubr.f32.vlgmr.msra.gmra.mrb[10].mxu0 %v7409_v55 }
 0x8e8   :  { %10129 = vmatpush3.bf16.msra.mxu0 %v11318_v40  ;;  %9632 = vmatprep.mubr.msk.f32.mxu0 %vm10473_vm0, %v10474_v1  ;;  %v10140_v40 = vpack.c.bf16 %v7937_v35, %v7930_v32 }
 0x8e9   :  { %10130 = vmatprep.subr.bf16.mxu0 %v10472_v0 }
 0x8ec   :  { %10132 = vmatpush3.bf16.msra.mxu0 %v11321_v47 }
 0x8ed   :  { %10133 = vmatprep.subr.bf16.mxu0 %v10472_v0 }
 0x8ef   :  { %9633 = vmatmul.mubr.f32.vlgmr.msra.gmra.mrb[10].mxu0 %v7409_v55 }
 0x8f0   :  { %10135 = vmatpush3.bf16.msra.mxu0 %v11357_v58  ;;  %9643 = vmatprep.mubr.msk.f32.mxu0 %vm10473_vm0, %v10474_v1 }
 0x8f1   :  { %10136 = vmatprep.subr.bf16.mxu0 %v10472_v0 }
 0x8f4   :  { %10138 = vmatpush3.bf16.msra.mxu0 %v10137_v51 }
 0x8f5   :  { %10139 = vmatprep.subr.bf16.mxu0 %v10472_v0 }
 0x9c2   :  { %v7821_v43 = vpop.f32.mrb[10].mxu0 }
 0x9c3   :  { %v10179_v45 = vadd.f32 %v7821_v43, %v7335_v17  ;;  %v9634_v46 = vpop.f32.mrb[11].mxu0 }
 0x9c5   :  { %vm7825_vm10 = vcmp.ge.f32.partialorder %v10179_v45, 0.0  ;;  %v7826_v56 = vmul.f32 0.05, %v10179_v45 }
 0x9c7   :  { %v7827_v47 = vsel %vm7825_vm10, %v10179_v45, %v7826_v56 }
 0x9c8   :  { %v7844_v4 = vsel %vm3890_vm9, %v7827_v47, 0 }
 0x9c9   :  { %v7915_v48 = vand.u32 4294901760, %v7844_v4 }
 0x9cb   :  { %v7916_v49 = vsub.f32 %v7844_v4, %v7915_v48 }
 0x9cd   :  { %v7917_v7 = vand.u32 4294901760, %v7916_v49 }
 0x9cf   :  { %v7918_v8 = vsub.f32 %v7916_v49, %v7917_v7 }
 0x9d1   :  { %v7919_v9 = vand.u32 4294901760, %v7918_v8 }
 0x9d3   :  { %9644 = vmatmul.mubr.f32.vlgmr.msra.gmra.mrb[12].mxu0 %v7919_v9 }
 0x9d4   :  { %10141 = vmatpush3.bf16.msra.mxu0 %v10140_v40  ;;  %9654 = vmatprep.mubr.msk.f32.mxu0 %vm10473_vm0, %v10474_v1 }
 0x9d5   :  { %10142 = vmatprep.subr.bf16.mxu0 %v10472_v0 }
 0x9d8   :  { %10144 = vmatpush3.bf16.msra.mxu0 %v10143_v42 }
 0x9d9   :  { %10145 = vmatprep.subr.bf16.mxu0 %v10472_v0 }
 0x9db   :  { %9655 = vmatmul.mubr.f32.vlgmr.msra.gmra.mrb[12].mxu0 %v7915_v48 }
 0x9dc   :  { %10147 = vmatpush3.bf16.msra.mxu0 %v10146_v20  ;;  %9665 = vmatprep.mubr.msk.f32.mxu0 %vm10473_vm0, %v10474_v1 }
 0x9dd   :  { %10148 = vmatprep.subr.bf16.mxu0 %v10472_v0 }
 0x9e0   :  { %10150 = vmatpush3.bf16.msra.mxu0 %v10149_v25 }
 0x9e1   :  { %10151 = vmatprep.subr.bf16.mxu0 %v10472_v0 }
 0x9e3   :  { %9666 = vmatmul.mubr.f32.vlgmr.msra.gmra.mrb[12].mxu0 %v7916_v49 }
 0x9e4   :  { %10153 = vmatpush3.bf16.msra.mxu0 %v11357_v58  ;;  %9676 = vmatprep.mubr.msk.f32.mxu0 %vm10473_vm0, %v10474_v1 }
 0x9e5   :  { %10154 = vmatprep.subr.bf16.mxu0 %v10472_v0 }
 0x9e8   :  { %10156 = vmatpush3.bf16.msra.mxu0 %v10137_v51 }
 0x9e9   :  { %10157 = vmatprep.subr.bf16.mxu0 %v10472_v0 }
 0x9eb   :  { %9677 = vmatmul.mubr.f32.vlgmr.msra.gmra.mrb[12].mxu0 %v7917_v7 }
 0x9ec   :  { %10159 = vmatpush3.bf16.msra.mxu0 %v10158_v37  ;;  %9687 = vmatprep.mubr.msk.f32.mxu0 %vm10473_vm0, %v10474_v1 }
 0x9ed   :  { %10160 = vmatprep.subr.bf16.mxu0 %v10472_v0 }
 0x9f0   :  { %10162 = vmatpush3.bf16.msra.mxu0 %v10161_v39 }
 0x9f1   :  { %10163 = vmatprep.subr.bf16.mxu0 %v10472_v0 }
 0x9f3   :  { %9688 = vmatmul.mubr.f32.vlgmr.msra.gmra.mrb[12].mxu0 %v7915_v48 }
 0x9f4   :  { %10165 = vmatpush3.bf16.msra.mxu0 %v11357_v58  ;;  %9698 = vmatprep.mubr.msk.f32.mxu0 %vm10473_vm0, %v10474_v1 }
 0x9f5   :  { %10166 = vmatprep.subr.bf16.mxu0 %v10472_v0 }
 0x9f8   :  { %10168 = vmatpush3.bf16.msra.mxu0 %v10137_v51 }
 0x9fb   :  { %9699 = vmatmul.mubr.f32.vlgmr.msra.gmra.mrb[12].mxu0 %v7915_v48 }
 0xace   :  { %v8327_v44 = vpop.f32.mrb[12].mxu0 }
 0xacf   :  { %v10180_v52 = vadd.f32 %v8327_v44, %v7841_v11  ;;  %v9700_v12 = vpop.f32.mrb[13].mxu0 }
 0xad1   :  { %v8356_v53 = vmul.f32 -1.442695, %v10180_v52 }
 0xad3   :  { %10388 = vpow2.f32 %v8356_v53 }
 0xadd   :  { %v10389_v13 = vpop.eup %10388 }
 0xade   :  { %v8334_v62 = vadd.f32 1.0, %v10389_v13 }
 0xae0   :  { %10390 = vrcp.f32 %v8334_v62 }
 0xaea   :  { %v10391_v2 = vpop.eup %10390 }
 0xaeb   :  { %8338 = vst.msk [vmem:[#allocation7] sm:$0xff] %vm8337_vm11, %v10391_v2 }
 0xaec   :  { %10451 = shalt.err (!%p10448_p6)
}
 0xaed   :  { %s10452_s13 = scalar_lea.hbm %s11401_s2, 128 }
 0xaee   :  { %p10453_p7 = scmp.ne.s32.totalorder %s11401_s2, %s10452_s13  ;;  %p10456_p8 = scmp.lt.u32.totalorder %s10452_s13, %s11401_s2 }
 0xaf0   :  { %p10458_p9 = pnand %p10456_p8, %p10453_p7 }
 0xaf2   :  { %10461 = shalt.err (!%p10458_p9)
}
 0xaf3   :  { %8348 = dma.vmem_to_hbm [thread:$0]  %s8346_s9, 128, %s11401_s2, [#allocation4]  }
 0xaf4   :  { %10466 = dma.done.wait [#allocation4], 128  }
 0xaf5   :  { %10467 = vsyncadd [#allocation4], 4294967168 }
 0xaf6   :  { %8352 = vsyncpa [#allocation3], 1 }
 0xaf7   :  { %8353 = vsyncpa [#allocation6], 1 }
 0xaf8   :  { %8354 = vsyncpa [#allocation4], 1 }

</bundles_post_ra>
